<compile_context>
chip_gen: v6e
topology: v6e:2x2x1
jax: 0.10.0
libtpu: 0.0.40
codegen_flags: <defaults>
</compile_context>

<pallas_src>
import math
import functools

import jax
import jax.numpy as jnp
from jax.experimental import pallas as pl
from jax.experimental.pallas import tpu as pltpu


def _vmem_limit_bytes():
    """~80% of physical VMEM (≈52 MiB on v7x, ≈102 MiB on v5e/v6e); 48 MiB fallback."""
    try:
        cap = int(getattr(pltpu.get_tpu_info(), "vmem_capacity_bytes", 0))
        if cap > 0:
            return int(cap * 0.8)
    except Exception:
        pass
    return 48 * 1024 * 1024


def _layer_norm(x, gamma, beta, eps):
    # x: (rows, E), gamma/beta: (1, E). Biased variance, matches nn.LayerNorm.
    mean = jnp.mean(x, axis=-1, keepdims=True)
    var = jnp.mean((x - mean) ** 2, axis=-1, keepdims=True)
    return (x - mean) * jax.lax.rsqrt(var + eps) * gamma + beta


def _gelu_erf(x):
    # matches the reference: x * 0.5 * (1 + erf(x / sqrt(2)))
    return x * 0.5 * (1.0 + jax.lax.erf(x / math.sqrt(2.0)))


def _pick_tile(dim, target):
    """Largest tile <= target that evenly divides dim (falls back to the full dim)."""
    if dim <= target:
        return dim
    for cand in (target, 512, 256, 128, 64, 32, 16, 8):
        if cand <= target and dim % cand == 0:
            return cand
    return dim


# --------------------------------------------------------------------------------------
# Kernel 1: per-head QKV projection.
# Grid: (batch, seq-tiles, heads) — all independent writes; x tile is resident across
# the innermost head axis, per-head (E, Dh) weight slices are streamed (never (E, E)).
# 1/sqrt(Dh) is pre-folded into wq/bq by the wrapper.
# --------------------------------------------------------------------------------------
def _qkv_kernel(x_ref, wq_ref, bq_ref, wk_ref, bk_ref, wv_ref, bv_ref,
                q_ref, k_ref, v_ref):
    xb = x_ref[0]                                   # (ts, E) bf16
    q = jnp.dot(xb, wq_ref[0], preferred_element_type=jnp.float32) + bq_ref[0]
    q_ref[0, 0] = q.astype(jnp.bfloat16)
    k = jnp.dot(xb, wk_ref[0], preferred_element_type=jnp.float32) + bk_ref[0]
    k_ref[0, 0] = k.astype(jnp.bfloat16)
    v = jnp.dot(xb, wv_ref[0], preferred_element_type=jnp.float32) + bv_ref[0]
    v_ref[0, 0] = v.astype(jnp.bfloat16)


# --------------------------------------------------------------------------------------
# Kernel 2: flash attention, head-major.
# Grid: (batch, heads, query-tiles, key-tiles); key-tile axis MUST stay innermost and
# "arbitrary" (online-softmax running state in VMEM scratch). Emits bf16 context
# (B, H, S, Dh) — the W_O projection consumes it directly as an MXU operand.
# --------------------------------------------------------------------------------------
def _attn_kernel(q_ref, k_ref, v_ref, mask_ref, o_ref, m_sc, l_sc, acc_sc):
    ki = pl.program_id(3)

    @pl.when(ki == 0)
    def _():
        m_sc[...] = jnp.full_like(m_sc, -jnp.inf)
        l_sc[...] = jnp.zeros_like(l_sc)
        acc_sc[...] = jnp.zeros_like(acc_sc)

    q = q_ref[0, 0]                                 # (tq, Dh) bf16, pre-scaled
    k = k_ref[0, 0]                                 # (tk, Dh) bf16
    v = v_ref[0, 0]                                 # (tk, Dh) bf16

    s = jax.lax.dot_general(q, k, (((1,), (1,)), ((), ())),
                            preferred_element_type=jnp.float32)   # (tq, tk) f32
    s = s + mask_ref[0]                             # (1, tk) additive mask, bcast rows

    m_prev = m_sc[...]                              # (tq, 1)
    m_new = jnp.maximum(m_prev, jnp.max(s, axis=-1, keepdims=True))
    alpha = jnp.exp(m_prev - m_new)
    p = jnp.exp(s - m_new)
    l_sc[...] = alpha * l_sc[...] + jnp.sum(p, axis=-1, keepdims=True)
    acc_sc[...] = alpha * acc_sc[...] + jnp.dot(
        p.astype(jnp.bfloat16), v, preferred_element_type=jnp.float32)
    m_sc[...] = m_new

    @pl.when(ki == pl.num_programs(3) - 1)
    def _():
        # approx reciprocal (EUP): ~1e-3 rel. error, fine for inference.
        o_ref[0, 0] = (acc_sc[...] * pl.reciprocal(l_sc[...], approx=True)
                       ).astype(o_ref.dtype)


# --------------------------------------------------------------------------------------
# Kernel 3: W_O projection reduced over heads + residual + LayerNorm-1.
# Grid: (batch, seq-tiles, heads); the head axis is the "arbitrary" reduction axis.
# Per-step W_O block is (Dh, E) — never the full (E, E) matrix.
# --------------------------------------------------------------------------------------
def _wo_ln_kernel(ctx_ref, wo_ref, bo_ref, x_ref, g_ref, b_ref,
                  o_ref, acc_sc, *, layer_norm_eps):
    hi = pl.program_id(2)

    @pl.when(hi == 0)
    def _():
        acc_sc[...] = jnp.zeros_like(acc_sc)

    acc_sc[...] += jnp.dot(ctx_ref[0, 0], wo_ref[0],
                           preferred_element_type=jnp.float32)

    @pl.when(hi == pl.num_programs(2) - 1)
    def _():
        y = x_ref[0] + acc_sc[...] + bo_ref[...]
        o_ref[0] = _layer_norm(y, g_ref[...], b_ref[...],
                               layer_norm_eps).astype(o_ref.dtype)


# --------------------------------------------------------------------------------------
# Kernel 4: FFN tiled over the intermediate dim (f32 accumulator) + residual + LN2.
# Grid: (row-tiles, inter-tiles); inter-tile axis is the "arbitrary" reduction axis.
# The bf16 cast of the row-resident input is hoisted into VMEM scratch at ji == 0.
# --------------------------------------------------------------------------------------
def _ffn_kernel(a_ref, w1_ref, b1_ref, w2_ref, b2_ref, ln2_g_ref, ln2_b_ref,
                o_ref, acc_sc, a_bf_sc, *, layer_norm_eps):
    ji = pl.program_id(1)

    @pl.when(ji == 0)
    def _():
        acc_sc[...] = jnp.zeros_like(acc_sc)
        a_bf_sc[...] = a_ref[...].astype(jnp.bfloat16)     # hoisted cast

    h = jnp.dot(a_bf_sc[...], w1_ref[...],
                preferred_element_type=jnp.float32) + b1_ref[...]
    h = _gelu_erf(h)
    acc_sc[...] += jnp.dot(h.astype(jnp.bfloat16), w2_ref[...],
                           preferred_element_type=jnp.float32)

    @pl.when(ji == pl.num_programs(1) - 1)
    def _():
        y = a_ref[...] + acc_sc[...] + b2_ref[...]
        o_ref[...] = _layer_norm(y, ln2_g_ref[...], ln2_b_ref[...],
                                 layer_norm_eps).astype(o_ref.dtype)


# --------------------------------------------------------------------------------------
# Wrapper
# --------------------------------------------------------------------------------------
def transformer_layer(x, mask, params, *, n_heads, layer_norm_eps=1e-12,
                      seq_tile=256, q_tile=128, k_tile=128,
                      row_tile=256, inter_tile=512):
    """x: (B, S, E) f32; mask: (B, 1, S) f32 additive mask (0 keep, -1e9 masked).

    Tile defaults: q/k = 128 everywhere (register-friendly, esp. v5e); row_tile = 256
    (safe under v7x's 64 MiB VMEM; raise to 512 on v6e to make the FFN MXU-bound).
    """
    B, S, E = x.shape
    inter = params["w1"].shape[1]
    assert E % n_heads == 0
    Dh = E // n_heads
    R = B * S

    ts = _pick_tile(S, seq_tile)      # QKV / W_O sequence tiles
    tq = _pick_tile(S, q_tile)        # attention query tiles
    tk = _pick_tile(S, k_tile)        # attention key tiles
    tm = _pick_tile(R, row_tile)      # FFN row tiles
    ti = _pick_tile(inter, inter_tile)
    n_s, n_q, n_k, n_r, n_i = S // ts, S // tq, S // tk, R // tm, inter // ti

    vmem_limit = _vmem_limit_bytes()
    bf16 = jnp.bfloat16
    inv_scale = 1.0 / math.sqrt(Dh)

    # ---- weight prep (f32 math, then bf16, head-major reshapes; done once by XLA) ----
    wq3 = (params["wq"] * inv_scale).reshape(E, n_heads, Dh).transpose(1, 0, 2).astype(bf16)
    wk3 = params["wk"].reshape(E, n_heads, Dh).transpose(1, 0, 2).astype(bf16)
    wv3 = params["wv"].reshape(E, n_heads, Dh).transpose(1, 0, 2).astype(bf16)
    bq3 = (params["bq"] * inv_scale).reshape(n_heads, 1, Dh)
    bk3 = params["bk"].reshape(n_heads, 1, Dh)
    bv3 = params["bv"].reshape(n_heads, 1, Dh)
    wo3 = params["wo"].reshape(n_heads, Dh, E).astype(bf16)   # contraction dim head-major
    w1 = params["w1"].astype(bf16)
    w2 = params["w2"].astype(bf16)

    x_bf = x.astype(bf16)             # bf16 copy for the QKV matmul (halves DMA)

    # ---- 1) per-head QKV projection ------------------------------------------------
    qkv_shape = jax.ShapeDtypeStruct((B, n_heads, S, Dh), bf16)
    qkv_out_spec = pl.BlockSpec((1, 1, ts, Dh), lambda b, s, h: (b, h, s, 0))
    w_head_spec = pl.BlockSpec((1, E, Dh), lambda b, s, h: (h, 0, 0))
    b_head_spec = pl.BlockSpec((1, 1, Dh), lambda b, s, h: (h, 0, 0))

    q4, k4, v4 = pl.pallas_call(
        _qkv_kernel,
        out_shape=(qkv_shape, qkv_shape, qkv_shape),
        grid_spec=pltpu.PrefetchScalarGridSpec(
            num_scalar_prefetch=0,
            grid=(B, n_s, n_heads),
            in_specs=[
                pl.BlockSpec((1, ts, E), lambda b, s, h: (b, s, 0)),   # x (bf16)
                w_head_spec, b_head_spec,                              # W_Q, b_Q (scaled)
                w_head_spec, b_head_spec,                              # W_K, b_K
                w_head_spec, b_head_spec,                              # W_V, b_V
            ],
            out_specs=[qkv_out_spec, qkv_out_spec, qkv_out_spec],
        ),
        compiler_params=pltpu.CompilerParams(
            dimension_semantics=("parallel", "parallel", "parallel"),
            vmem_limit_bytes=vmem_limit),
        cost_estimate=pl.CostEstimate(
            flops=6 * R * E * E, transcendentals=0,
            bytes_accessed=R * E * 2 + 3 * E * E * 2 + 3 * R * E * 2),
    )(x_bf, wq3, bq3, wk3, bk3, wv3, bv3)

    # ---- 2) flash attention (head-major, online softmax over key tiles) -------------
    qblk = pl.BlockSpec((1, 1, tq, Dh), lambda b, h, qi, ki: (b, h, qi, 0))
    kblk = pl.BlockSpec((1, 1, tk, Dh), lambda b, h, qi, ki: (b, h, ki, 0))

    ctx = pl.pallas_call(
        _attn_kernel,
        out_shape=jax.ShapeDtypeStruct((B, n_heads, S, Dh), bf16),
        grid_spec=pltpu.PrefetchScalarGridSpec(
            num_scalar_prefetch=0,
            grid=(B, n_heads, n_q, n_k),
            in_specs=[
                qblk, kblk, kblk,                                          # q, k, v
                pl.BlockSpec((1, 1, tk), lambda b, h, qi, ki: (b, 0, ki)),  # mask
            ],
            out_specs=pl.BlockSpec((1, 1, tq, Dh), lambda b, h, qi, ki: (b, h, qi, 0)),
            scratch_shapes=[
                pltpu.VMEM((tq, 1), jnp.float32),     # running max
                pltpu.VMEM((tq, 1), jnp.float32),     # running sum
                pltpu.VMEM((tq, Dh), jnp.float32),    # context accumulator
            ],
        ),
        compiler_params=pltpu.CompilerParams(
            # Key-tile axis must stay innermost + "arbitrary" (online-softmax carry).
            dimension_semantics=("parallel", "parallel", "parallel", "arbitrary"),
            vmem_limit_bytes=vmem_limit),
        cost_estimate=pl.CostEstimate(
            flops=4 * B * S * S * E,
            transcendentals=B * n_heads * S * S,
            bytes_accessed=4 * B * S * E * 2 + B * S * 4),
    )(q4, k4, v4, mask)

    # ---- 3) W_O (reduced over heads) + residual + LayerNorm-1 ------------------------
    row3_spec = pl.BlockSpec((1, ts, E), lambda b, s, h: (b, s, 0))
    vec3_spec = pl.BlockSpec((1, E), lambda b, s, h: (0, 0))

    attn_out = pl.pallas_call(
        functools.partial(_wo_ln_kernel, layer_norm_eps=layer_norm_eps),
        out_shape=jax.ShapeDtypeStruct((B, S, E), jnp.float32),
        grid_spec=pltpu.PrefetchScalarGridSpec(
            num_scalar_prefetch=0,
            grid=(B, n_s, n_heads),
            in_specs=[
                pl.BlockSpec((1, 1, ts, Dh), lambda b, s, h: (b, h, s, 0)),  # context
                pl.BlockSpec((1, Dh, E), lambda b, s, h: (h, 0, 0)),         # W_O head slice
                vec3_spec,                                                   # b_O
                row3_spec,                                                   # x (residual, f32)
                vec3_spec, vec3_spec,                                        # ln1 gamma, beta
            ],
            out_specs=row3_spec,
            scratch_shapes=[pltpu.VMEM((ts, E), jnp.float32)],
        ),
        compiler_params=pltpu.CompilerParams(
            dimension_semantics=("parallel", "parallel", "arbitrary"),
            vmem_limit_bytes=vmem_limit),
        cost_estimate=pl.CostEstimate(
            flops=2 * R * E * E, transcendentals=0,
            bytes_accessed=R * E * 2 + E * E * 2 + 2 * R * E * 4),
    )(ctx, wo3, params["bo"], x, params["ln1_g"], params["ln1_b"])

    # ---- 4) FFN (inter-dim tiled) + residual + LayerNorm-2 ---------------------------
    a2d = attn_out.reshape(R, E)

    out2d = pl.pallas_call(
        functools.partial(_ffn_kernel, layer_norm_eps=layer_norm_eps),
        out_shape=jax.ShapeDtypeStruct((R, E), jnp.float32),
        grid_spec=pltpu.PrefetchScalarGridSpec(
            num_scalar_prefetch=0,
            grid=(n_r, n_i),
            in_specs=[
                pl.BlockSpec((tm, E), lambda r, j: (r, 0)),   # attn_out rows (f32)
                pl.BlockSpec((E, ti), lambda r, j: (0, j)),   # W1 inter tile
                pl.BlockSpec((1, ti), lambda r, j: (0, j)),   # b1 inter tile
                pl.BlockSpec((ti, E), lambda r, j: (j, 0)),   # W2 inter tile
                pl.BlockSpec((1, E), lambda r, j: (0, 0)),    # b2
                pl.BlockSpec((1, E), lambda r, j: (0, 0)),    # ln2 gamma
                pl.BlockSpec((1, E), lambda r, j: (0, 0)),    # ln2 beta
            ],
            out_specs=pl.BlockSpec((tm, E), lambda r, j: (r, 0)),
            scratch_shapes=[pltpu.VMEM((tm, E), jnp.float32),   # f32 accumulator
                            pltpu.VMEM((tm, E), jnp.bfloat16)], # hoisted bf16 input
        ),
        compiler_params=pltpu.CompilerParams(
            dimension_semantics=("parallel", "arbitrary"),
            vmem_limit_bytes=vmem_limit),
        cost_estimate=pl.CostEstimate(
            flops=4 * R * E * inter,
            transcendentals=R * inter,
            bytes_accessed=2 * R * E * 4 + 2 * E * inter * 2),
    )(a2d, w1, params["b1"], w2, params["b2"], params["ln2_g"], params["ln2_b"])

    return out2d.reshape(B, S, E)


# --------------------------------------------------------------------------------------
# Parameters and pure-JAX reference
# --------------------------------------------------------------------------------------
def init_params(key, emb_dim, inter_size):
    """Deterministic synthetic parameters. Linear weights stored as (in, out), f32."""
    ks = jax.random.split(key, 12)
    std = 0.02
    return {
        "wq": jax.random.normal(ks[0], (emb_dim, emb_dim), jnp.float32) * std,
        "bq": jax.random.normal(ks[1], (1, emb_dim), jnp.float32) * std,
        "wk": jax.random.normal(ks[2], (emb_dim, emb_dim), jnp.float32) * std,
        "bk": jax.random.normal(ks[3], (1, emb_dim), jnp.float32) * std,
        "wv": jax.random.normal(ks[4], (emb_dim, emb_dim), jnp.float32) * std,
        "bv": jax.random.normal(ks[5], (1, emb_dim), jnp.float32) * std,
        "wo": jax.random.normal(ks[6], (emb_dim, emb_dim), jnp.float32) * std,
        "bo": jax.random.normal(ks[7], (1, emb_dim), jnp.float32) * std,
        "ln1_g": jnp.ones((1, emb_dim), jnp.float32),
        "ln1_b": jnp.zeros((1, emb_dim), jnp.float32),
        "w1": jax.random.normal(ks[8], (emb_dim, inter_size), jnp.float32) * std,
        "b1": jax.random.normal(ks[9], (1, inter_size), jnp.float32) * std,
        "w2": jax.random.normal(ks[10], (inter_size, emb_dim), jnp.float32) * std,
        "b2": jax.random.normal(ks[11], (1, emb_dim), jnp.float32) * std,
        "ln2_g": jnp.ones((1, emb_dim), jnp.float32),
        "ln2_b": jnp.zeros((1, emb_dim), jnp.float32),
    }


def reference_jax(x, mask, params, *, n_heads, layer_norm_eps=1e-12):
    """Pure-JAX f32 reference of the PyTorch forward (dropout = identity)."""
    B, S, E = x.shape
    Dh = E // n_heads

    def ln(y, g, b):
        mu = jnp.mean(y, -1, keepdims=True)
        var = jnp.mean((y - mu) ** 2, -1, keepdims=True)
        return (y - mu) / jnp.sqrt(var + layer_norm_eps) * g + b

    q = x @ params["wq"] + params["bq"]
    k = x @ params["wk"] + params["bk"]
    v = x @ params["wv"] + params["bv"]
    split = lambda t: t.reshape(B, S, n_heads, Dh).transpose(0, 2, 1, 3)
    q, k, v = split(q), split(k), split(v)
    sc = jnp.einsum("bhsd,bhtd->bhst", q, k) / math.sqrt(Dh)
    sc = sc + mask[:, :, None, :]
    pr = jax.nn.softmax(sc, -1)
    ctx = jnp.einsum("bhst,bhtd->bhsd", pr, v).transpose(0, 2, 1, 3).reshape(B, S, E)
    attn = ln(x + ctx @ params["wo"] + params["bo"], params["ln1_g"], params["ln1_b"])
    h = _gelu_erf(attn @ params["w1"] + params["b1"])
    ffn = h @ params["w2"] + params["b2"]
    return ln(attn + ffn, params["ln2_g"], params["ln2_b"])


if __name__ == "__main__":
    B, S, E, H, INTER = 2, 8, 32, 4, 64

    key = jax.random.PRNGKey(0)
    kx, km, kp = jax.random.split(key, 3)

    x = jax.random.normal(kx, (B, S, E), jnp.float32)
    # Additive attention mask: 0 = keep, -1e9 = masked (last key position of batch 1 masked).
    keep = jnp.ones((B, 1, S), jnp.float32).at[1, 0, -1].set(0.0)
    mask = (1.0 - keep) * -1e9

    params = init_params(kp, E, INTER)

    fn = jax.jit(functools.partial(transformer_layer, n_heads=H))
    out = fn(x, mask, params)
    out = jax.block_until_ready(out)

    ref = reference_jax(x, mask, params, n_heads=H)
    assert out.shape == (B, S, E)
    # bf16 MXU operands (f32 accumulation) loosen the tolerance vs the f32 reference.
    assert jnp.allclose(out, ref, atol=2e-2, rtol=2e-2), "mismatch vs JAX reference"

    print("KERNEL_OK")
</pallas_src>

<mosaic_0001>
module attributes {stable_mosaic.version = 11 : i64} {
  func.func @_qkv_kernel(%arg0: i32, %arg1: i32, %arg2: i32, %arg3: memref<1x8x32xbf16, #tpu.memory_space<vmem>>, %arg4: memref<1x32x8xbf16, #tpu.memory_space<vmem>>, %arg5: memref<1x1x8xf32, #tpu.memory_space<vmem>>, %arg6: memref<1x32x8xbf16, #tpu.memory_space<vmem>>, %arg7: memref<1x1x8xf32, #tpu.memory_space<vmem>>, %arg8: memref<1x32x8xbf16, #tpu.memory_space<vmem>>, %arg9: memref<1x1x8xf32, #tpu.memory_space<vmem>>, %arg10: memref<1x1x8x8xbf16, #tpu.memory_space<vmem>>, %arg11: memref<1x1x8x8xbf16, #tpu.memory_space<vmem>>, %arg12: memref<1x1x8x8xbf16, #tpu.memory_space<vmem>>) attributes {dimension_semantics = [#tpu.dimension_semantics<parallel>, #tpu.dimension_semantics<parallel>, #tpu.dimension_semantics<parallel>], iteration_bounds = array<i64: 2, 1, 4>, scalar_prefetch = 0 : i64, scratch_operands = 0 : i64, tpu.core_type = #tpu.core_type<tc>, window_params = [{transform_indices = @transform_0, window_bounds = array<i64: 1, 8, 32>}, {transform_indices = @transform_1, window_bounds = array<i64: 1, 32, 8>}, {transform_indices = @transform_2, window_bounds = array<i64: 1, 1, 8>}, {transform_indices = @transform_3, window_bounds = array<i64: 1, 32, 8>}, {transform_indices = @transform_4, window_bounds = array<i64: 1, 1, 8>}, {transform_indices = @transform_5, window_bounds = array<i64: 1, 32, 8>}, {transform_indices = @transform_6, window_bounds = array<i64: 1, 1, 8>}, {transform_indices = @transform_7, window_bounds = array<i64: 1, 1, 8, 8>}, {transform_indices = @transform_8, window_bounds = array<i64: 1, 1, 8, 8>}, {transform_indices = @transform_9, window_bounds = array<i64: 1, 1, 8, 8>}]} {
    %c0 = arith.constant 0 : index
    %c0_0 = arith.constant 0 : index
    %c0_1 = arith.constant 0 : index
    %0 = vector.load %arg3[%c0, %c0_0, %c0_1] : memref<1x8x32xbf16, #tpu.memory_space<vmem>>, vector<1x8x32xbf16>
    %1 = vector.shape_cast %0 : vector<1x8x32xbf16> to vector<8x32xbf16>
    %c0_2 = arith.constant 0 : index
    %c0_3 = arith.constant 0 : index
    %c0_4 = arith.constant 0 : index
    %2 = vector.load %arg4[%c0_2, %c0_3, %c0_4] : memref<1x32x8xbf16, #tpu.memory_space<vmem>>, vector<1x32x8xbf16>
    %3 = vector.shape_cast %2 : vector<1x32x8xbf16> to vector<32x8xbf16>
    %cst = arith.constant dense<0.000000e+00> : vector<8x8xf32>
    %4 = tpu.matmul %1, %3, %cst {dimension_numbers = #tpu.dot_dimension_numbers<[1], [0], [0], [1], [0, 0, 1, 1], [], []>} : vector<8x32xbf16>, vector<32x8xbf16>, vector<8x8xf32> -> vector<8x8xf32>
    %c0_5 = arith.constant 0 : index
    %c0_6 = arith.constant 0 : index
    %c0_7 = arith.constant 0 : index
    %5 = vector.load %arg5[%c0_5, %c0_6, %c0_7] : memref<1x1x8xf32, #tpu.memory_space<vmem>>, vector<1x1x8xf32>
    %6 = vector.shape_cast %5 : vector<1x1x8xf32> to vector<1x8xf32>
    %7 = vector.broadcast %6 : vector<1x8xf32> to vector<8x8xf32>
    %8 = arith.addf %4, %7 : vector<8x8xf32>
    %9 = arith.truncf %8 : vector<8x8xf32> to vector<8x8xbf16>
    %c0_8 = arith.constant 0 : index
    %c0_9 = arith.constant 0 : index
    %c0_10 = arith.constant 0 : index
    %c0_11 = arith.constant 0 : index
    %10 = vector.load %arg10[%c0_8, %c0_9, %c0_10, %c0_11] : memref<1x1x8x8xbf16, #tpu.memory_space<vmem>>, vector<1x1x8x8xbf16>
    %11 = vector.shape_cast %10 : vector<1x1x8x8xbf16> to vector<8x8xbf16>
    %12 = vector.shape_cast %9 : vector<8x8xbf16> to vector<1x1x8x8xbf16>
    tpu.vector_store %arg10[%c0_8, %c0_9, %c0_10, %c0_11], %12 {strides = array<i32>} : memref<1x1x8x8xbf16, #tpu.memory_space<vmem>>, vector<1x1x8x8xbf16>,
    %c0_12 = arith.constant 0 : index
    %c0_13 = arith.constant 0 : index
    %c0_14 = arith.constant 0 : index
    %13 = vector.load %arg6[%c0_12, %c0_13, %c0_14] : memref<1x32x8xbf16, #tpu.memory_space<vmem>>, vector<1x32x8xbf16>
    %14 = vector.shape_cast %13 : vector<1x32x8xbf16> to vector<32x8xbf16>
    %cst_15 = arith.constant dense<0.000000e+00> : vector<8x8xf32>
    %15 = tpu.matmul %1, %14, %cst_15 {dimension_numbers = #tpu.dot_dimension_numbers<[1], [0], [0], [1], [0, 0, 1, 1], [], []>} : vector<8x32xbf16>, vector<32x8xbf16>, vector<8x8xf32> -> vector<8x8xf32>
    %c0_16 = arith.constant 0 : index
    %c0_17 = arith.constant 0 : index
    %c0_18 = arith.constant 0 : index
    %16 = vector.load %arg7[%c0_16, %c0_17, %c0_18] : memref<1x1x8xf32, #tpu.memory_space<vmem>>, vector<1x1x8xf32>
    %17 = vector.shape_cast %16 : vector<1x1x8xf32> to vector<1x8xf32>
    %18 = vector.broadcast %17 : vector<1x8xf32> to vector<8x8xf32>
    %19 = arith.addf %15, %18 : vector<8x8xf32>
    %20 = arith.truncf %19 : vector<8x8xf32> to vector<8x8xbf16>
    %c0_19 = arith.constant 0 : index
    %c0_20 = arith.constant 0 : index
    %c0_21 = arith.constant 0 : index
    %c0_22 = arith.constant 0 : index
    %21 = vector.load %arg11[%c0_19, %c0_20, %c0_21, %c0_22] : memref<1x1x8x8xbf16, #tpu.memory_space<vmem>>, vector<1x1x8x8xbf16>
    %22 = vector.shape_cast %21 : vector<1x1x8x8xbf16> to vector<8x8xbf16>
    %23 = vector.shape_cast %20 : vector<8x8xbf16> to vector<1x1x8x8xbf16>
    tpu.vector_store %arg11[%c0_19, %c0_20, %c0_21, %c0_22], %23 {strides = array<i32>} : memref<1x1x8x8xbf16, #tpu.memory_space<vmem>>, vector<1x1x8x8xbf16>,
    %c0_23 = arith.constant 0 : index
    %c0_24 = arith.constant 0 : index
    %c0_25 = arith.constant 0 : index
    %24 = vector.load %arg8[%c0_23, %c0_24, %c0_25] : memref<1x32x8xbf16, #tpu.memory_space<vmem>>, vector<1x32x8xbf16>
    %25 = vector.shape_cast %24 : vector<1x32x8xbf16> to vector<32x8xbf16>
    %cst_26 = arith.constant dense<0.000000e+00> : vector<8x8xf32>
    %26 = tpu.matmul %1, %25, %cst_26 {dimension_numbers = #tpu.dot_dimension_numbers<[1], [0], [0], [1], [0, 0, 1, 1], [], []>} : vector<8x32xbf16>, vector<32x8xbf16>, vector<8x8xf32> -> vector<8x8xf32>
    %c0_27 = arith.constant 0 : index
    %c0_28 = arith.constant 0 : index
    %c0_29 = arith.constant 0 : index
    %27 = vector.load %arg9[%c0_27, %c0_28, %c0_29] : memref<1x1x8xf32, #tpu.memory_space<vmem>>, vector<1x1x8xf32>
    %28 = vector.shape_cast %27 : vector<1x1x8xf32> to vector<1x8xf32>
    %29 = vector.broadcast %28 : vector<1x8xf32> to vector<8x8xf32>
    %30 = arith.addf %26, %29 : vector<8x8xf32>
    %31 = arith.truncf %30 : vector<8x8xf32> to vector<8x8xbf16>
    %c0_30 = arith.constant 0 : index
    %c0_31 = arith.constant 0 : index
    %c0_32 = arith.constant 0 : index
    %c0_33 = arith.constant 0 : index
    %32 = vector.load %arg12[%c0_30, %c0_31, %c0_32, %c0_33] : memref<1x1x8x8xbf16, #tpu.memory_space<vmem>>, vector<1x1x8x8xbf16>
    %33 = vector.shape_cast %32 : vector<1x1x8x8xbf16> to vector<8x8xbf16>
    %34 = vector.shape_cast %31 : vector<8x8xbf16> to vector<1x1x8x8xbf16>
    tpu.vector_store %arg12[%c0_30, %c0_31, %c0_32, %c0_33], %34 {strides = array<i32>} : memref<1x1x8x8xbf16, #tpu.memory_space<vmem>>, vector<1x1x8x8xbf16>,
    return
  }
  func.func @transform_0(%arg0: i32, %arg1: i32, %arg2: i32) -> (i32, i32, i32) {
    %c0_i32 = arith.constant 0 : i32
    %c0_i32_0 = arith.constant 0 : i32
    return %arg0, %arg1, %c0_i32 : i32, i32, i32
  }
  func.func @transform_1(%arg0: i32, %arg1: i32, %arg2: i32) -> (i32, i32, i32) {
    %c0_i32 = arith.constant 0 : i32
    %c0_i32_0 = arith.constant 0 : i32
    %c0_i32_1 = arith.constant 0 : i32
    return %arg2, %c0_i32, %c0_i32_0 : i32, i32, i32
  }
  func.func @transform_2(%arg0: i32, %arg1: i32, %arg2: i32) -> (i32, i32, i32) {
    %c0_i32 = arith.constant 0 : i32
    %c0_i32_0 = arith.constant 0 : i32
    %c0_i32_1 = arith.constant 0 : i32
    return %arg2, %c0_i32, %c0_i32_0 : i32, i32, i32
  }
  func.func @transform_3(%arg0: i32, %arg1: i32, %arg2: i32) -> (i32, i32, i32) {
    %c0_i32 = arith.constant 0 : i32
    %c0_i32_0 = arith.constant 0 : i32
    %c0_i32_1 = arith.constant 0 : i32
    return %arg2, %c0_i32, %c0_i32_0 : i32, i32, i32
  }
  func.func @transform_4(%arg0: i32, %arg1: i32, %arg2: i32) -> (i32, i32, i32) {
    %c0_i32 = arith.constant 0 : i32
    %c0_i32_0 = arith.constant 0 : i32
    %c0_i32_1 = arith.constant 0 : i32
    return %arg2, %c0_i32, %c0_i32_0 : i32, i32, i32
  }
  func.func @transform_5(%arg0: i32, %arg1: i32, %arg2: i32) -> (i32, i32, i32) {
    %c0_i32 = arith.constant 0 : i32
    %c0_i32_0 = arith.constant 0 : i32
    %c0_i32_1 = arith.constant 0 : i32
    return %arg2, %c0_i32, %c0_i32_0 : i32, i32, i32
  }
  func.func @transform_6(%arg0: i32, %arg1: i32, %arg2: i32) -> (i32, i32, i32) {
    %c0_i32 = arith.constant 0 : i32
    %c0_i32_0 = arith.constant 0 : i32
    %c0_i32_1 = arith.constant 0 : i32
    return %arg2, %c0_i32, %c0_i32_0 : i32, i32, i32
  }
  func.func @transform_7(%arg0: i32, %arg1: i32, %arg2: i32) -> (i32, i32, i32, i32) {
    %c0_i32 = arith.constant 0 : i32
    %c0_i32_0 = arith.constant 0 : i32
    return %arg0, %arg2, %arg1, %c0_i32 : i32, i32, i32, i32
  }
  func.func @transform_8(%arg0: i32, %arg1: i32, %arg2: i32) -> (i32, i32, i32, i32) {
    %c0_i32 = arith.constant 0 : i32
    %c0_i32_0 = arith.constant 0 : i32
    return %arg0, %arg2, %arg1, %c0_i32 : i32, i32, i32, i32
  }
  func.func @transform_9(%arg0: i32, %arg1: i32, %arg2: i32) -> (i32, i32, i32, i32) {
    %c0_i32 = arith.constant 0 : i32
    %c0_i32_0 = arith.constant 0 : i32
    return %arg0, %arg2, %arg1, %c0_i32 : i32, i32, i32, i32
  }
}

module attributes {stable_mosaic.version = 11 : i64} {
  func.func @_attn_kernel(%arg0: i32, %arg1: i32, %arg2: i32, %arg3: i32, %arg4: memref<1x1x8x8xbf16, #tpu.memory_space<vmem>>, %arg5: memref<1x1x8x8xbf16, #tpu.memory_space<vmem>>, %arg6: memref<1x1x8x8xbf16, #tpu.memory_space<vmem>>, %arg7: memref<1x1x8xf32, #tpu.memory_space<vmem>>, %arg8: memref<1x1x8x8xbf16, #tpu.memory_space<vmem>>, %arg9: memref<8x1xf32, #tpu.memory_space<vmem>>, %arg10: memref<8x1xf32, #tpu.memory_space<vmem>>, %arg11: memref<8x8xf32, #tpu.memory_space<vmem>>) attributes {dimension_semantics = [#tpu.dimension_semantics<parallel>, #tpu.dimension_semantics<parallel>, #tpu.dimension_semantics<parallel>, #tpu.dimension_semantics<arbitrary>], iteration_bounds = array<i64: 2, 4, 1, 1>, scalar_prefetch = 0 : i64, scratch_operands = 3 : i64, tpu.core_type = #tpu.core_type<tc>, window_params = [{transform_indices = @transform_0, window_bounds = array<i64: 1, 1, 8, 8>}, {transform_indices = @transform_1, window_bounds = array<i64: 1, 1, 8, 8>}, {transform_indices = @transform_2, window_bounds = array<i64: 1, 1, 8, 8>}, {transform_indices = @transform_3, window_bounds = array<i64: 1, 1, 8>}, {transform_indices = @transform_4, window_bounds = array<i64: 1, 1, 8, 8>}]} {
    %c0_i32 = arith.constant 0 : i32
    %0 = arith.cmpi eq, %arg3, %c0_i32 : i32
    %1 = arith.extui %0 : i1 to i32
    %c0_i32_0 = arith.constant 0 : i32
    %2 = arith.cmpi ne, %1, %c0_i32_0 : i32
    scf.if %2 {
      %cst_32 = arith.constant 0xFF800000 : f32
      %40 = vector.broadcast %cst_32 : f32 to vector<8x1xf32>
      %c0_33 = arith.constant 0 : index
      %c0_34 = arith.constant 0 : index
      %41 = vector.load %arg9[%c0_33, %c0_34] : memref<8x1xf32, #tpu.memory_space<vmem>>, vector<8x1xf32>
      tpu.vector_store %arg9[%c0_33, %c0_34], %40 {strides = array<i32>} : memref<8x1xf32, #tpu.memory_space<vmem>>, vector<8x1xf32>,
      %cst_35 = arith.constant 0.000000e+00 : f32
      %42 = vector.broadcast %cst_35 : f32 to vector<8x1xf32>
      %c0_36 = arith.constant 0 : index
      %c0_37 = arith.constant 0 : index
      %43 = vector.load %arg10[%c0_36, %c0_37] : memref<8x1xf32, #tpu.memory_space<vmem>>, vector<8x1xf32>
      tpu.vector_store %arg10[%c0_36, %c0_37], %42 {strides = array<i32>} : memref<8x1xf32, #tpu.memory_space<vmem>>, vector<8x1xf32>,
      %cst_38 = arith.constant 0.000000e+00 : f32
      %44 = vector.broadcast %cst_38 : f32 to vector<8x8xf32>
      %c0_39 = arith.constant 0 : index
      %c0_40 = arith.constant 0 : index
      %45 = vector.load %arg11[%c0_39, %c0_40] : memref<8x8xf32, #tpu.memory_space<vmem>>, vector<8x8xf32>
      tpu.vector_store %arg11[%c0_39, %c0_40], %44 {strides = array<i32>} : memref<8x8xf32, #tpu.memory_space<vmem>>, vector<8x8xf32>,
    } else {
    }
    %c0 = arith.constant 0 : index
    %c0_1 = arith.constant 0 : index
    %c0_2 = arith.constant 0 : index
    %c0_3 = arith.constant 0 : index
    %3 = vector.load %arg4[%c0, %c0_1, %c0_2, %c0_3] : memref<1x1x8x8xbf16, #tpu.memory_space<vmem>>, vector<1x1x8x8xbf16>
    %4 = vector.shape_cast %3 : vector<1x1x8x8xbf16> to vector<8x8xbf16>
    %c0_4 = arith.constant 0 : index
    %c0_5 = arith.constant 0 : index
    %c0_6 = arith.constant 0 : index
    %c0_7 = arith.constant 0 : index
    %5 = vector.load %arg5[%c0_4, %c0_5, %c0_6, %c0_7] : memref<1x1x8x8xbf16, #tpu.memory_space<vmem>>, vector<1x1x8x8xbf16>
    %6 = vector.shape_cast %5 : vector<1x1x8x8xbf16> to vector<8x8xbf16>
    %c0_8 = arith.constant 0 : index
    %c0_9 = arith.constant 0 : index
    %c0_10 = arith.constant 0 : index
    %c0_11 = arith.constant 0 : index
    %7 = vector.load %arg6[%c0_8, %c0_9, %c0_10, %c0_11] : memref<1x1x8x8xbf16, #tpu.memory_space<vmem>>, vector<1x1x8x8xbf16>
    %8 = vector.shape_cast %7 : vector<1x1x8x8xbf16> to vector<8x8xbf16>
    %cst = arith.constant dense<0.000000e+00> : vector<8x8xf32>
    %9 = tpu.matmul %4, %6, %cst {dimension_numbers = #tpu.dot_dimension_numbers<[1], [1], [0], [0], [0, 0, 1, 0], [], []>} : vector<8x8xbf16>, vector<8x8xbf16>, vector<8x8xf32> -> vector<8x8xf32>
    %c0_12 = arith.constant 0 : index
    %c0_13 = arith.constant 0 : index
    %c0_14 = arith.constant 0 : index
    %10 = vector.load %arg7[%c0_12, %c0_13, %c0_14] : memref<1x1x8xf32, #tpu.memory_space<vmem>>, vector<1x1x8xf32>
    %11 = vector.shape_cast %10 : vector<1x1x8xf32> to vector<1x8xf32>
    %12 = vector.broadcast %11 : vector<1x8xf32> to vector<8x8xf32>
    %13 = arith.addf %9, %12 : vector<8x8xf32>
    %c0_15 = arith.constant 0 : index
    %c0_16 = arith.constant 0 : index
    %14 = vector.load %arg9[%c0_15, %c0_16] : memref<8x1xf32, #tpu.memory_space<vmem>>, vector<8x1xf32>
    %cst_17 = arith.constant dense<0xFF800000> : vector<8xf32>
    %15 = vector.multi_reduction <maximumf>, %13, %cst_17 [1] : vector<8x8xf32> to vector<8xf32>
    %16 = vector.shape_cast %15 : vector<8xf32> to vector<8x1xf32>
    %17 = arith.maximumf %14, %16 : vector<8x1xf32>
    %18 = arith.subf %14, %17 : vector<8x1xf32>
    %19 = math.exp %18 : vector<8x1xf32>
    %20 = vector.broadcast %17 : vector<8x1xf32> to vector<8x8xf32>
    %21 = arith.subf %13, %20 : vector<8x8xf32>
    %22 = math.exp %21 : vector<8x8xf32>
    %c0_18 = arith.constant 0 : index
    %c0_19 = arith.constant 0 : index
    %23 = vector.load %arg10[%c0_18, %c0_19] : memref<8x1xf32, #tpu.memory_space<vmem>>, vector<8x1xf32>
    %24 = arith.mulf %19, %23 : vector<8x1xf32>
    %cst_20 = arith.constant dense<0.000000e+00> : vector<8xf32>
    %25 = vector.multi_reduction <add>, %22, %cst_20 [1] : vector<8x8xf32> to vector<8xf32>
    %26 = vector.shape_cast %25 : vector<8xf32> to vector<8x1xf32>
    %27 = arith.addf %24, %26 : vector<8x1xf32>
    %c0_21 = arith.constant 0 : index
    %c0_22 = arith.constant 0 : index
    %28 = vector.load %arg10[%c0_21, %c0_22] : memref<8x1xf32, #tpu.memory_space<vmem>>, vector<8x1xf32>
    tpu.vector_store %arg10[%c0_21, %c0_22], %27 {strides = array<i32>} : memref<8x1xf32, #tpu.memory_space<vmem>>, vector<8x1xf32>,
    %c0_23 = arith.constant 0 : index
    %c0_24 = arith.constant 0 : index
    %29 = vector.load %arg11[%c0_23, %c0_24] : memref<8x8xf32, #tpu.memory_space<vmem>>, vector<8x8xf32>
    %30 = vector.broadcast %19 : vector<8x1xf32> to vector<8x8xf32>
    %31 = arith.mulf %30, %29 : vector<8x8xf32>
    %32 = arith.truncf %22 : vector<8x8xf32> to vector<8x8xbf16>
    %cst_25 = arith.constant dense<0.000000e+00> : vector<8x8xf32>
    %33 = tpu.matmul %32, %8, %cst_25 {dimension_numbers = #tpu.dot_dimension_numbers<[1], [0], [0], [1], [0, 0, 1, 1], [], []>} : vector<8x8xbf16>, vector<8x8xbf16>, vector<8x8xf32> -> vector<8x8xf32>
    %34 = arith.addf %31, %33 : vector<8x8xf32>
    %c0_26 = arith.constant 0 : index
    %c0_27 = arith.constant 0 : index
    %35 = vector.load %arg11[%c0_26, %c0_27] : memref<8x8xf32, #tpu.memory_space<vmem>>, vector<8x8xf32>
    tpu.vector_store %arg11[%c0_26, %c0_27], %34 {strides = array<i32>} : memref<8x8xf32, #tpu.memory_space<vmem>>, vector<8x8xf32>,
    %c0_28 = arith.constant 0 : index
    %c0_29 = arith.constant 0 : index
    %36 = vector.load %arg9[%c0_28, %c0_29] : memref<8x1xf32, #tpu.memory_space<vmem>>, vector<8x1xf32>
    tpu.vector_store %arg9[%c0_28, %c0_29], %17 {strides = array<i32>} : memref<8x1xf32, #tpu.memory_space<vmem>>, vector<8x1xf32>,
    %c0_i32_30 = arith.constant 0 : i32
    %37 = arith.cmpi eq, %arg3, %c0_i32_30 : i32
    %38 = arith.extui %37 : i1 to i32
    %c0_i32_31 = arith.constant 0 : i32
    %39 = arith.cmpi ne, %38, %c0_i32_31 : i32
    scf.if %39 {
      %c0_32 = arith.constant 0 : index
      %c0_33 = arith.constant 0 : index
      %40 = vector.load %arg11[%c0_32, %c0_33] : memref<8x8xf32, #tpu.memory_space<vmem>>, vector<8x8xf32>
      %c0_34 = arith.constant 0 : index
      %c0_35 = arith.constant 0 : index
      %41 = vector.load %arg10[%c0_34, %c0_35] : memref<8x1xf32, #tpu.memory_space<vmem>>, vector<8x1xf32>
      %42 = tpu.reciprocal %41 {approx = true} : vector<8x1xf32> -> vector<8x1xf32>
      %43 = vector.broadcast %42 : vector<8x1xf32> to vector<8x8xf32>
      %44 = arith.mulf %40, %43 : vector<8x8xf32>
      %45 = arith.truncf %44 : vector<8x8xf32> to vector<8x8xbf16>
      %c0_36 = arith.constant 0 : index
      %c0_37 = arith.constant 0 : index
      %c0_38 = arith.constant 0 : index
      %c0_39 = arith.constant 0 : index
      %46 = vector.load %arg8[%c0_36, %c0_37, %c0_38, %c0_39] : memref<1x1x8x8xbf16, #tpu.memory_space<vmem>>, vector<1x1x8x8xbf16>
      %47 = vector.shape_cast %46 : vector<1x1x8x8xbf16> to vector<8x8xbf16>
      %48 = vector.shape_cast %45 : vector<8x8xbf16> to vector<1x1x8x8xbf16>
      tpu.vector_store %arg8[%c0_36, %c0_37, %c0_38, %c0_39], %48 {strides = array<i32>} : memref<1x1x8x8xbf16, #tpu.memory_space<vmem>>, vector<1x1x8x8xbf16>,
    } else {
    }
    return
  }
  func.func @transform_0(%arg0: i32, %arg1: i32, %arg2: i32, %arg3: i32) -> (i32, i32, i32, i32) {
    %c0_i32 = arith.constant 0 : i32
    %c0_i32_0 = arith.constant 0 : i32
    return %arg0, %arg1, %arg2, %c0_i32 : i32, i32, i32, i32
  }
  func.func @transform_1(%arg0: i32, %arg1: i32, %arg2: i32, %arg3: i32) -> (i32, i32, i32, i32) {
    %c0_i32 = arith.constant 0 : i32
    %c0_i32_0 = arith.constant 0 : i32
    return %arg0, %arg1, %arg3, %c0_i32 : i32, i32, i32, i32
  }
  func.func @transform_2(%arg0: i32, %arg1: i32, %arg2: i32, %arg3: i32) -> (i32, i32, i32, i32) {
    %c0_i32 = arith.constant 0 : i32
    %c0_i32_0 = arith.constant 0 : i32
    return %arg0, %arg1, %arg3, %c0_i32 : i32, i32, i32, i32
  }
  func.func @transform_3(%arg0: i32, %arg1: i32, %arg2: i32, %arg3: i32) -> (i32, i32, i32) {
    %c0_i32 = arith.constant 0 : i32
    %c0_i32_0 = arith.constant 0 : i32
    return %arg0, %c0_i32, %arg3 : i32, i32, i32
  }
  func.func @transform_4(%arg0: i32, %arg1: i32, %arg2: i32, %arg3: i32) -> (i32, i32, i32, i32) {
    %c0_i32 = arith.constant 0 : i32
    %c0_i32_0 = arith.constant 0 : i32
    return %arg0, %arg1, %arg2, %c0_i32 : i32, i32, i32, i32
  }
}

module attributes {stable_mosaic.version = 11 : i64} {
  func.func @_wo_ln_kernel(%arg0: i32, %arg1: i32, %arg2: i32, %arg3: memref<1x1x8x8xbf16, #tpu.memory_space<vmem>>, %arg4: memref<1x8x32xbf16, #tpu.memory_space<vmem>>, %arg5: memref<1x32xf32, #tpu.memory_space<vmem>>, %arg6: memref<1x8x32xf32, #tpu.memory_space<vmem>>, %arg7: memref<1x32xf32, #tpu.memory_space<vmem>>, %arg8: memref<1x32xf32, #tpu.memory_space<vmem>>, %arg9: memref<1x8x32xf32, #tpu.memory_space<vmem>>, %arg10: memref<8x32xf32, #tpu.memory_space<vmem>>) attributes {dimension_semantics = [#tpu.dimension_semantics<parallel>, #tpu.dimension_semantics<parallel>, #tpu.dimension_semantics<arbitrary>], iteration_bounds = array<i64: 2, 1, 4>, scalar_prefetch = 0 : i64, scratch_operands = 1 : i64, tpu.core_type = #tpu.core_type<tc>, window_params = [{transform_indices = @transform_0, window_bounds = array<i64: 1, 1, 8, 8>}, {transform_indices = @transform_1, window_bounds = array<i64: 1, 8, 32>}, {pipeline_mode = #tpu.pipeline_mode<synchronous>, transform_indices = @transform_2, window_bounds = array<i64: 1, 32>}, {transform_indices = @transform_3, window_bounds = array<i64: 1, 8, 32>}, {pipeline_mode = #tpu.pipeline_mode<synchronous>, transform_indices = @transform_4, window_bounds = array<i64: 1, 32>}, {pipeline_mode = #tpu.pipeline_mode<synchronous>, transform_indices = @transform_5, window_bounds = array<i64: 1, 32>}, {transform_indices = @transform_6, window_bounds = array<i64: 1, 8, 32>}]} {
    %c0_i32 = arith.constant 0 : i32
    %0 = arith.cmpi eq, %arg2, %c0_i32 : i32
    %1 = arith.extui %0 : i1 to i32
    %c0_i32_0 = arith.constant 0 : i32
    %2 = arith.cmpi ne, %1, %c0_i32_0 : i32
    scf.if %2 {
      %cst_12 = arith.constant 0.000000e+00 : f32
      %14 = vector.broadcast %cst_12 : f32 to vector<8x32xf32>
      %c0_13 = arith.constant 0 : index
      %c0_14 = arith.constant 0 : index
      %15 = vector.load %arg10[%c0_13, %c0_14] : memref<8x32xf32, #tpu.memory_space<vmem>>, vector<8x32xf32>
      tpu.vector_store %arg10[%c0_13, %c0_14], %14 {strides = array<i32>} : memref<8x32xf32, #tpu.memory_space<vmem>>, vector<8x32xf32>,
    } else {
    }
    %c0 = arith.constant 0 : index
    %c0_1 = arith.constant 0 : index
    %3 = vector.load %arg10[%c0, %c0_1] : memref<8x32xf32, #tpu.memory_space<vmem>>, vector<8x32xf32>
    %c0_2 = arith.constant 0 : index
    %c0_3 = arith.constant 0 : index
    %c0_4 = arith.constant 0 : index
    %c0_5 = arith.constant 0 : index
    %4 = vector.load %arg3[%c0_2, %c0_3, %c0_4, %c0_5] : memref<1x1x8x8xbf16, #tpu.memory_space<vmem>>, vector<1x1x8x8xbf16>
    %5 = vector.shape_cast %4 : vector<1x1x8x8xbf16> to vector<8x8xbf16>
    %c0_6 = arith.constant 0 : index
    %c0_7 = arith.constant 0 : index
    %c0_8 = arith.constant 0 : index
    %6 = vector.load %arg4[%c0_6, %c0_7, %c0_8] : memref<1x8x32xbf16, #tpu.memory_space<vmem>>, vector<1x8x32xbf16>
    %7 = vector.shape_cast %6 : vector<1x8x32xbf16> to vector<8x32xbf16>
    %cst = arith.constant dense<0.000000e+00> : vector<8x32xf32>
    %8 = tpu.matmul %5, %7, %cst {dimension_numbers = #tpu.dot_dimension_numbers<[1], [0], [0], [1], [0, 0, 1, 1], [], []>} : vector<8x8xbf16>, vector<8x32xbf16>, vector<8x32xf32> -> vector<8x32xf32>
    %9 = arith.addf %3, %8 : vector<8x32xf32>
    %c0_9 = arith.constant 0 : index
    %c0_10 = arith.constant 0 : index
    %10 = vector.load %arg10[%c0_9, %c0_10] : memref<8x32xf32, #tpu.memory_space<vmem>>, vector<8x32xf32>
    tpu.vector_store %arg10[%c0_9, %c0_10], %9 {strides = array<i32>} : memref<8x32xf32, #tpu.memory_space<vmem>>, vector<8x32xf32>,
    %c3_i32 = arith.constant 3 : i32
    %11 = arith.cmpi eq, %arg2, %c3_i32 : i32
    %12 = arith.extui %11 : i1 to i32
    %c0_i32_11 = arith.constant 0 : i32
    %13 = arith.cmpi ne, %12, %c0_i32_11 : i32
    scf.if %13 {
      %c0_12 = arith.constant 0 : index
      %c0_13 = arith.constant 0 : index
      %c0_14 = arith.constant 0 : index
      %14 = vector.load %arg6[%c0_12, %c0_13, %c0_14] : memref<1x8x32xf32, #tpu.memory_space<vmem>>, vector<1x8x32xf32>
      %15 = vector.shape_cast %14 : vector<1x8x32xf32> to vector<8x32xf32>
      %c0_15 = arith.constant 0 : index
      %c0_16 = arith.constant 0 : index
      %16 = vector.load %arg10[%c0_15, %c0_16] : memref<8x32xf32, #tpu.memory_space<vmem>>, vector<8x32xf32>
      %17 = arith.addf %15, %16 : vector<8x32xf32>
      %c0_17 = arith.constant 0 : index
      %c0_18 = arith.constant 0 : index
      %18 = vector.load %arg5[%c0_17, %c0_18] : memref<1x32xf32, #tpu.memory_space<vmem>>, vector<1x32xf32>
      %19 = vector.broadcast %18 : vector<1x32xf32> to vector<8x32xf32>
      %20 = arith.addf %17, %19 : vector<8x32xf32>
      %c0_19 = arith.constant 0 : index
      %c0_20 = arith.constant 0 : index
      %21 = vector.load %arg7[%c0_19, %c0_20] : memref<1x32xf32, #tpu.memory_space<vmem>>, vector<1x32xf32>
      %c0_21 = arith.constant 0 : index
      %c0_22 = arith.constant 0 : index
      %22 = vector.load %arg8[%c0_21, %c0_22] : memref<1x32xf32, #tpu.memory_space<vmem>>, vector<1x32xf32>
      %cst_23 = arith.constant dense<0.000000e+00> : vector<8xf32>
      %23 = vector.multi_reduction <add>, %20, %cst_23 [1] : vector<8x32xf32> to vector<8xf32>
      %24 = vector.shape_cast %23 : vector<8xf32> to vector<8x1xf32>
      %cst_24 = arith.constant 3.200000e+01 : f32
      %25 = vector.broadcast %cst_24 : f32 to vector<8x1xf32>
      %26 = arith.divf %24, %25 : vector<8x1xf32>
      %27 = vector.broadcast %26 : vector<8x1xf32> to vector<8x32xf32>
      %28 = arith.subf %20, %27 : vector<8x32xf32>
      %29 = arith.mulf %28, %28 : vector<8x32xf32>
      %cst_25 = arith.constant dense<0.000000e+00> : vector<8xf32>
      %30 = vector.multi_reduction <add>, %29, %cst_25 [1] : vector<8x32xf32> to vector<8xf32>
      %31 = vector.shape_cast %30 : vector<8xf32> to vector<8x1xf32>
      %cst_26 = arith.constant 3.200000e+01 : f32
      %32 = vector.broadcast %cst_26 : f32 to vector<8x1xf32>
      %33 = arith.divf %31, %32 : vector<8x1xf32>
      %34 = vector.broadcast %26 : vector<8x1xf32> to vector<8x32xf32>
      %35 = arith.subf %20, %34 : vector<8x32xf32>
      %cst_27 = arith.constant 9.99999996E-13 : f32
      %36 = vector.broadcast %cst_27 : f32 to vector<8x1xf32>
      %37 = arith.addf %33, %36 : vector<8x1xf32>
      %38 = math.rsqrt %37 : vector<8x1xf32>
      %39 = vector.broadcast %38 : vector<8x1xf32> to vector<8x32xf32>
      %40 = arith.mulf %35, %39 : vector<8x32xf32>
      %41 = vector.broadcast %21 : vector<1x32xf32> to vector<8x32xf32>
      %42 = arith.mulf %40, %41 : vector<8x32xf32>
      %43 = vector.broadcast %22 : vector<1x32xf32> to vector<8x32xf32>
      %44 = arith.addf %42, %43 : vector<8x32xf32>
      %c0_28 = arith.constant 0 : index
      %c0_29 = arith.constant 0 : index
      %c0_30 = arith.constant 0 : index
      %45 = vector.load %arg9[%c0_28, %c0_29, %c0_30] : memref<1x8x32xf32, #tpu.memory_space<vmem>>, vector<1x8x32xf32>
      %46 = vector.shape_cast %45 : vector<1x8x32xf32> to vector<8x32xf32>
      %47 = vector.shape_cast %44 : vector<8x32xf32> to vector<1x8x32xf32>
      tpu.vector_store %arg9[%c0_28, %c0_29, %c0_30], %47 {strides = array<i32>} : memref<1x8x32xf32, #tpu.memory_space<vmem>>, vector<1x8x32xf32>,
    } else {
    }
    return
  }
  func.func @transform_0(%arg0: i32, %arg1: i32, %arg2: i32) -> (i32, i32, i32, i32) {
    %c0_i32 = arith.constant 0 : i32
    %c0_i32_0 = arith.constant 0 : i32
    return %arg0, %arg2, %arg1, %c0_i32 : i32, i32, i32, i32
  }
  func.func @transform_1(%arg0: i32, %arg1: i32, %arg2: i32) -> (i32, i32, i32) {
    %c0_i32 = arith.constant 0 : i32
    %c0_i32_0 = arith.constant 0 : i32
    %c0_i32_1 = arith.constant 0 : i32
    return %arg2, %c0_i32, %c0_i32_0 : i32, i32, i32
  }
  func.func @transform_2(%arg0: i32, %arg1: i32, %arg2: i32) -> (i32, i32) {
    %c0_i32 = arith.constant 0 : i32
    %c0_i32_0 = arith.constant 0 : i32
    %c0_i32_1 = arith.constant 0 : i32
    return %c0_i32, %c0_i32_0 : i32, i32
  }
  func.func @transform_3(%arg0: i32, %arg1: i32, %arg2: i32) -> (i32, i32, i32) {
    %c0_i32 = arith.constant 0 : i32
    %c0_i32_0 = arith.constant 0 : i32
    return %arg0, %arg1, %c0_i32 : i32, i32, i32
  }
  func.func @transform_4(%arg0: i32, %arg1: i32, %arg2: i32) -> (i32, i32) {
    %c0_i32 = arith.constant 0 : i32
    %c0_i32_0 = arith.constant 0 : i32
    %c0_i32_1 = arith.constant 0 : i32
    return %c0_i32, %c0_i32_0 : i32, i32
  }
  func.func @transform_5(%arg0: i32, %arg1: i32, %arg2: i32) -> (i32, i32) {
    %c0_i32 = arith.constant 0 : i32
    %c0_i32_0 = arith.constant 0 : i32
    %c0_i32_1 = arith.constant 0 : i32
    return %c0_i32, %c0_i32_0 : i32, i32
  }
  func.func @transform_6(%arg0: i32, %arg1: i32, %arg2: i32) -> (i32, i32, i32) {
    %c0_i32 = arith.constant 0 : i32
    %c0_i32_0 = arith.constant 0 : i32
    return %arg0, %arg1, %c0_i32 : i32, i32, i32
  }
}

module attributes {stable_mosaic.version = 11 : i64} {
  func.func @_ffn_kernel(%arg0: i32, %arg1: i32, %arg2: memref<16x32xf32, #tpu.memory_space<vmem>>, %arg3: memref<32x64xbf16, #tpu.memory_space<vmem>>, %arg4: memref<1x64xf32, #tpu.memory_space<vmem>>, %arg5: memref<64x32xbf16, #tpu.memory_space<vmem>>, %arg6: memref<1x32xf32, #tpu.memory_space<vmem>>, %arg7: memref<1x32xf32, #tpu.memory_space<vmem>>, %arg8: memref<1x32xf32, #tpu.memory_space<vmem>>, %arg9: memref<16x32xf32, #tpu.memory_space<vmem>>, %arg10: memref<16x32xf32, #tpu.memory_space<vmem>>, %arg11: memref<16x32xbf16, #tpu.memory_space<vmem>>) attributes {dimension_semantics = [#tpu.dimension_semantics<parallel>, #tpu.dimension_semantics<arbitrary>], iteration_bounds = array<i64: 1, 1>, scalar_prefetch = 0 : i64, scratch_operands = 2 : i64, tpu.core_type = #tpu.core_type<tc>, window_params = [{transform_indices = @transform_0, window_bounds = array<i64: 16, 32>}, {transform_indices = @transform_1, window_bounds = array<i64: 32, 64>}, {transform_indices = @transform_2, window_bounds = array<i64: 1, 64>}, {transform_indices = @transform_3, window_bounds = array<i64: 64, 32>}, {pipeline_mode = #tpu.pipeline_mode<synchronous>, transform_indices = @transform_4, window_bounds = array<i64: 1, 32>}, {pipeline_mode = #tpu.pipeline_mode<synchronous>, transform_indices = @transform_5, window_bounds = array<i64: 1, 32>}, {pipeline_mode = #tpu.pipeline_mode<synchronous>, transform_indices = @transform_6, window_bounds = array<i64: 1, 32>}, {transform_indices = @transform_7, window_bounds = array<i64: 16, 32>}]} {
    %c0_i32 = arith.constant 0 : i32
    %0 = arith.cmpi eq, %arg1, %c0_i32 : i32
    %1 = arith.extui %0 : i1 to i32
    %c0_i32_0 = arith.constant 0 : i32
    %2 = arith.cmpi ne, %1, %c0_i32_0 : i32
    scf.if %2 {
      %cst_18 = arith.constant 0.000000e+00 : f32
      %26 = vector.broadcast %cst_18 : f32 to vector<16x32xf32>
      %c0_19 = arith.constant 0 : index
      %c0_20 = arith.constant 0 : index
      %27 = vector.load %arg10[%c0_19, %c0_20] : memref<16x32xf32, #tpu.memory_space<vmem>>, vector<16x32xf32>
      tpu.vector_store %arg10[%c0_19, %c0_20], %26 {strides = array<i32>} : memref<16x32xf32, #tpu.memory_space<vmem>>, vector<16x32xf32>,
      %c0_21 = arith.constant 0 : index
      %c0_22 = arith.constant 0 : index
      %28 = vector.load %arg2[%c0_21, %c0_22] : memref<16x32xf32, #tpu.memory_space<vmem>>, vector<16x32xf32>
      %29 = arith.truncf %28 : vector<16x32xf32> to vector<16x32xbf16>
      %c0_23 = arith.constant 0 : index
      %c0_24 = arith.constant 0 : index
      %30 = vector.load %arg11[%c0_23, %c0_24] : memref<16x32xbf16, #tpu.memory_space<vmem>>, vector<16x32xbf16>
      tpu.vector_store %arg11[%c0_23, %c0_24], %29 {strides = array<i32>} : memref<16x32xbf16, #tpu.memory_space<vmem>>, vector<16x32xbf16>,
    } else {
    }
    %c0 = arith.constant 0 : index
    %c0_1 = arith.constant 0 : index
    %3 = vector.load %arg11[%c0, %c0_1] : memref<16x32xbf16, #tpu.memory_space<vmem>>, vector<16x32xbf16>
    %c0_2 = arith.constant 0 : index
    %c0_3 = arith.constant 0 : index
    %4 = vector.load %arg3[%c0_2, %c0_3] : memref<32x64xbf16, #tpu.memory_space<vmem>>, vector<32x64xbf16>
    %cst = arith.constant dense<0.000000e+00> : vector<16x64xf32>
    %5 = tpu.matmul %3, %4, %cst {dimension_numbers = #tpu.dot_dimension_numbers<[1], [0], [0], [1], [0, 0, 1, 1], [], []>} : vector<16x32xbf16>, vector<32x64xbf16>, vector<16x64xf32> -> vector<16x64xf32>
    %c0_4 = arith.constant 0 : index
    %c0_5 = arith.constant 0 : index
    %6 = vector.load %arg4[%c0_4, %c0_5] : memref<1x64xf32, #tpu.memory_space<vmem>>, vector<1x64xf32>
    %7 = vector.broadcast %6 : vector<1x64xf32> to vector<16x64xf32>
    %8 = arith.addf %5, %7 : vector<16x64xf32>
    %cst_6 = arith.constant 5.000000e-01 : f32
    %9 = vector.broadcast %cst_6 : f32 to vector<16x64xf32>
    %10 = arith.mulf %8, %9 : vector<16x64xf32>
    %cst_7 = arith.constant 1.41421354 : f32
    %11 = vector.broadcast %cst_7 : f32 to vector<16x64xf32>
    %12 = arith.divf %8, %11 : vector<16x64xf32>
    %13 = math.erf %12 : vector<16x64xf32>
    %cst_8 = arith.constant 1.000000e+00 : f32
    %14 = vector.broadcast %cst_8 : f32 to vector<16x64xf32>
    %15 = arith.addf %14, %13 : vector<16x64xf32>
    %16 = arith.mulf %10, %15 : vector<16x64xf32>
    %c0_9 = arith.constant 0 : index
    %c0_10 = arith.constant 0 : index
    %17 = vector.load %arg10[%c0_9, %c0_10] : memref<16x32xf32, #tpu.memory_space<vmem>>, vector<16x32xf32>
    %18 = arith.truncf %16 : vector<16x64xf32> to vector<16x64xbf16>
    %c0_11 = arith.constant 0 : index
    %c0_12 = arith.constant 0 : index
    %19 = vector.load %arg5[%c0_11, %c0_12] : memref<64x32xbf16, #tpu.memory_space<vmem>>, vector<64x32xbf16>
    %cst_13 = arith.constant dense<0.000000e+00> : vector<16x32xf32>
    %20 = tpu.matmul %18, %19, %cst_13 {dimension_numbers = #tpu.dot_dimension_numbers<[1], [0], [0], [1], [0, 0, 1, 1], [], []>} : vector<16x64xbf16>, vector<64x32xbf16>, vector<16x32xf32> -> vector<16x32xf32>
    %21 = arith.addf %17, %20 : vector<16x32xf32>
    %c0_14 = arith.constant 0 : index
    %c0_15 = arith.constant 0 : index
    %22 = vector.load %arg10[%c0_14, %c0_15] : memref<16x32xf32, #tpu.memory_space<vmem>>, vector<16x32xf32>
    tpu.vector_store %arg10[%c0_14, %c0_15], %21 {strides = array<i32>} : memref<16x32xf32, #tpu.memory_space<vmem>>, vector<16x32xf32>,
    %c0_i32_16 = arith.constant 0 : i32
    %23 = arith.cmpi eq, %arg1, %c0_i32_16 : i32
    %24 = arith.extui %23 : i1 to i32
    %c0_i32_17 = arith.constant 0 : i32
    %25 = arith.cmpi ne, %24, %c0_i32_17 : i32
    scf.if %25 {
      %c0_18 = arith.constant 0 : index
      %c0_19 = arith.constant 0 : index
      %26 = vector.load %arg2[%c0_18, %c0_19] : memref<16x32xf32, #tpu.memory_space<vmem>>, vector<16x32xf32>
      %c0_20 = arith.constant 0 : index
      %c0_21 = arith.constant 0 : index
      %27 = vector.load %arg10[%c0_20, %c0_21] : memref<16x32xf32, #tpu.memory_space<vmem>>, vector<16x32xf32>
      %28 = arith.addf %26, %27 : vector<16x32xf32>
      %c0_22 = arith.constant 0 : index
      %c0_23 = arith.constant 0 : index
      %29 = vector.load %arg6[%c0_22, %c0_23] : memref<1x32xf32, #tpu.memory_space<vmem>>, vector<1x32xf32>
      %30 = vector.broadcast %29 : vector<1x32xf32> to vector<16x32xf32>
      %31 = arith.addf %28, %30 : vector<16x32xf32>
      %c0_24 = arith.constant 0 : index
      %c0_25 = arith.constant 0 : index
      %32 = vector.load %arg7[%c0_24, %c0_25] : memref<1x32xf32, #tpu.memory_space<vmem>>, vector<1x32xf32>
      %c0_26 = arith.constant 0 : index
      %c0_27 = arith.constant 0 : index
      %33 = vector.load %arg8[%c0_26, %c0_27] : memref<1x32xf32, #tpu.memory_space<vmem>>, vector<1x32xf32>
      %cst_28 = arith.constant dense<0.000000e+00> : vector<16xf32>
      %34 = vector.multi_reduction <add>, %31, %cst_28 [1] : vector<16x32xf32> to vector<16xf32>
      %35 = vector.shape_cast %34 : vector<16xf32> to vector<16x1xf32>
      %cst_29 = arith.constant 3.200000e+01 : f32
      %36 = vector.broadcast %cst_29 : f32 to vector<16x1xf32>
      %37 = arith.divf %35, %36 : vector<16x1xf32>
      %38 = vector.broadcast %37 : vector<16x1xf32> to vector<16x32xf32>
      %39 = arith.subf %31, %38 : vector<16x32xf32>
      %40 = arith.mulf %39, %39 : vector<16x32xf32>
      %cst_30 = arith.constant dense<0.000000e+00> : vector<16xf32>
      %41 = vector.multi_reduction <add>, %40, %cst_30 [1] : vector<16x32xf32> to vector<16xf32>
      %42 = vector.shape_cast %41 : vector<16xf32> to vector<16x1xf32>
      %cst_31 = arith.constant 3.200000e+01 : f32
      %43 = vector.broadcast %cst_31 : f32 to vector<16x1xf32>
      %44 = arith.divf %42, %43 : vector<16x1xf32>
      %45 = vector.broadcast %37 : vector<16x1xf32> to vector<16x32xf32>
      %46 = arith.subf %31, %45 : vector<16x32xf32>
      %cst_32 = arith.constant 9.99999996E-13 : f32
      %47 = vector.broadcast %cst_32 : f32 to vector<16x1xf32>
      %48 = arith.addf %44, %47 : vector<16x1xf32>
      %49 = math.rsqrt %48 : vector<16x1xf32>
      %50 = vector.broadcast %49 : vector<16x1xf32> to vector<16x32xf32>
      %51 = arith.mulf %46, %50 : vector<16x32xf32>
      %52 = vector.broadcast %32 : vector<1x32xf32> to vector<16x32xf32>
      %53 = arith.mulf %51, %52 : vector<16x32xf32>
      %54 = vector.broadcast %33 : vector<1x32xf32> to vector<16x32xf32>
      %55 = arith.addf %53, %54 : vector<16x32xf32>
      %c0_33 = arith.constant 0 : index
      %c0_34 = arith.constant 0 : index
      %56 = vector.load %arg9[%c0_33, %c0_34] : memref<16x32xf32, #tpu.memory_space<vmem>>, vector<16x32xf32>
      tpu.vector_store %arg9[%c0_33, %c0_34], %55 {strides = array<i32>} : memref<16x32xf32, #tpu.memory_space<vmem>>, vector<16x32xf32>,
    } else {
    }
    return
  }
  func.func @transform_0(%arg0: i32, %arg1: i32) -> (i32, i32) {
    %c0_i32 = arith.constant 0 : i32
    %c0_i32_0 = arith.constant 0 : i32
    return %arg0, %c0_i32 : i32, i32
  }
  func.func @transform_1(%arg0: i32, %arg1: i32) -> (i32, i32) {
    %c0_i32 = arith.constant 0 : i32
    %c0_i32_0 = arith.constant 0 : i32
    return %c0_i32, %arg1 : i32, i32
  }
  func.func @transform_2(%arg0: i32, %arg1: i32) -> (i32, i32) {
    %c0_i32 = arith.constant 0 : i32
    %c0_i32_0 = arith.constant 0 : i32
    return %c0_i32, %arg1 : i32, i32
  }
  func.func @transform_3(%arg0: i32, %arg1: i32) -> (i32, i32) {
    %c0_i32 = arith.constant 0 : i32
    %c0_i32_0 = arith.constant 0 : i32
    return %arg1, %c0_i32 : i32, i32
  }
  func.func @transform_4(%arg0: i32, %arg1: i32) -> (i32, i32) {
    %c0_i32 = arith.constant 0 : i32
    %c0_i32_0 = arith.constant 0 : i32
    %c0_i32_1 = arith.constant 0 : i32
    return %c0_i32, %c0_i32_0 : i32, i32
  }
  func.func @transform_5(%arg0: i32, %arg1: i32) -> (i32, i32) {
    %c0_i32 = arith.constant 0 : i32
    %c0_i32_0 = arith.constant 0 : i32
    %c0_i32_1 = arith.constant 0 : i32
    return %c0_i32, %c0_i32_0 : i32, i32
  }
  func.func @transform_6(%arg0: i32, %arg1: i32) -> (i32, i32) {
    %c0_i32 = arith.constant 0 : i32
    %c0_i32_0 = arith.constant 0 : i32
    %c0_i32_1 = arith.constant 0 : i32
    return %c0_i32, %c0_i32_0 : i32, i32
  }
  func.func @transform_7(%arg0: i32, %arg1: i32) -> (i32, i32) {
    %c0_i32 = arith.constant 0 : i32
    %c0_i32_0 = arith.constant 0 : i32
    return %arg0, %c0_i32 : i32, i32
  }
}

</mosaic_0001>

<bundles_post_ra>
// kernel: transformer_layer.5
= control target key start
LH: loop header
LB: loop body
LE: loop exit
PB: predicated region body
PF: predicated region fallthrough
CT: control target
= control target key end

     0   :  { %s849_s15 = smov 0   ;;  %s851_s16 = smov 0   ;;  %s926_s0 = inlined_call_operand.vmem [shape: bf16[2,4,8,8], index: 0, kind: input, shape index: {}]   ;;  %s927_s1 = inlined_call_operand.vmem [shape: bf16[2,4,8,8], index: 1, kind: input, shape index: {}]   ;;  %s928_s2 = inlined_call_operand.vmem [shape: bf16[2,4,8,8], index: 2, kind: input, shape index: {}]   ;;  %s929_s3 = inlined_call_operand.vmem [shape: f32[2,1,8], index: 3, kind: input, shape index: {}]   ;;  %s930_s4 = inlined_call_operand.vmem [shape: bf16[2,4,8,8], index: 4, kind: output, shape index: {}]  }
   0x1   :  { %s853_s17 = smov 0   ;;  %s855_s18 = smov 0  }
   0x2   :  { %s857_s19 = smov 0  }
   0x3 LB: > { %s36_s20 = sadd.s32 1, %s810_s17  ;;  %s40_s21 = sadd.s32 1, %s814_s18  ;;  %s818_s19 = sphi %s857_s19, %s14_s19   ;;  %s814_s18 = sphi %s855_s18, %s934_s18   ;;  %s810_s17 = sphi %s853_s17, %s933_s17   ;;  %s806_s16 = sphi %s851_s16, %s932_s16   ;;  %s802_s15 = sphi %s849_s15, %s931_s15  }
   0x4   : > { %p38_p0 = scmp.ge.s32.totalorder %s36_s20, 4  ;;  %p698_p1 = scmp.ge.s32.totalorder %s818_s19, 1 }
   0x5   : > { %p255_p2 = scmp.lt.s32.totalorder %s818_s19, 9 }
   0x6   : > { %s936_s20 = smov (%p38_p0, %s36_s20), 0  ;;  %s938_s21 = smov (!%p38_p0, %s40_s21), %s814_s18 }
   0x7   : > { %p256_p3 = pnand %p698_p1, %p255_p2  ;;  %p42_p4 = scmp.ge.s32.totalorder %s938_s21, 2 }
   0x8   : > { %p321_p5 = scmp.lt.s32.totalorder (!%p256_p3), %s806_s16, 1  ;;  %p323_p6 = scmp.lt.s32.totalorder (!%p256_p3), %s802_s15, 3 }
   0x9   : > { %s940_s21 = smov (%p42_p4, %s938_s21), 0  ;;  %259 = sbr.rel (%p256_p3) target bundleno = 798 (0x31e), region = 36 }
   0xe   : > { %vm379_vm0 = vcmask 64512   ;;  %v820_v0 = vmov 0.0   ;;  %vm821_vm1 = vmmov 0   ;;  %s942_s16 = smov (!%p321_p5, %s806_s16), 1  ;;  %s944_s15 = smov (!%p323_p6, %s802_s15), 3  ;;  %vm376_vm2 = vcmask 7168  }
   0xf   : > { %716 = vmatprep.subr.bf16.mxu0 %v820_v0  ;;  %380 = vst.msk [vmem:[#allocation4] sm:$0xff] %vm379_vm0, %v820_v0  ;;  %718 = vmatprep.mubr.msk.bf16.mxu0 %vm821_vm1, %v820_v0  ;;  %s699_s22 = sshll.u32 %s942_s16, 2  ;;  %v822_v4 = vmov -inf   ;;  %s359_s7 = scalar_lea.vmem %s929_s3, %s942_s16  ;;  %v823_v12 = vmov 0   ;;  %vm473_vm3 = vcmask 1043456   ;;  %vm533_vm4 = vcmask 60416  }
  0x10   : > { %722 = vmatprep.subr.bf16.mxu1 %v820_v0  ;;  %724 = vmatprep.mubr.msk.bf16.mxu1 %vm821_vm1, %v820_v0  ;;  %s329_s23 = sadd.s32 %s699_s22, %s944_s15  ;;  %377 = vst.msk [vmem:[#allocation2] sm:$0xff] %vm376_vm2, %v822_v4  ;;  %378 = vst.msk [vmem:[#allocation3] sm:$0xff] %vm376_vm2, %v820_v0  ;;  %v707_v5 = vld [vmem:[%s359_s7] ss:$0 sm:$0xff] }
  0x11   : > { %s880_s24 = sshll.u32 %s329_s23, 2  ;;  %772 = vset.pattern.permute.xlu0 %v823_v12  ;;  %773 = vset.pattern.permute.xlu1 %v823_v12 }
  0x12   : > { %s342_s27 = scalar_lea.vmem %s927_s1, %s880_s24  ;;  %s331_s30 = scalar_lea.vmem %s926_s0, %s880_s24 }
  0x13   : > { %v382_v1 = vld [vmem:[%s342_s27] sm:$0xf]  ;;  %s353_s10 = scalar_lea.vmem %s928_s2, %s880_s24  ;;  %s370_s13 = scalar_lea.vmem %s930_s4, %s880_s24 }
  0x14   : > { %v396_v2 = vsel %vm379_vm0, %v382_v1, 0  ;;  %v381_v3 = vld [vmem:[%s331_s30] sm:$0xf] }
  0x15   : > { %717 = vmatpush3.bf16.xpose.msra.mxu0 %v396_v2  ;;  %v383_v17 = vld [vmem:[%s353_s10] sm:$0xf] }
  0x16   : > { %v475_v18 = vsel %vm473_vm3, %v383_v17, 0  ;;  %v462_v33 = vld [vmem:[#allocation4] sm:$0xff] }
  0x17   : > { %v438_v13 = vld [vmem:[#allocation2] sm:$0xff]  ;;  %723 = vmatpush3.bf16.msra.mxu1 %v475_v18  ;;  %v454_v27 = vld [vmem:[#allocation3] sm:$0xff] }
  0x1c   : > { %719 = vmatmul.mubr.msk.bf16.vlgmr.msra.gmra.mxu0 %vm379_vm0, %v381_v3 }
  0xdc   : > { %v432_v6 = vpop.f32.mrf.mxu0 }
  0xdd   : > { %v433_v7 = vadd.f32 %v707_v5, %v432_v6 }
  0xde   : > { %v720_v8 = vpop.f32.mrf.mxu0 }
  0xdf   : > { %v439_v9 = vsel %vm379_vm0, %v433_v7, -inf }
  0xe0   : > { %440 = vmax.xlane.f32.xlu0 %v439_v9  ;;  %v435_v10 = vpop.f32.mrf.mxu0 }
  0xe2   : > { %v721_v11 = vpop.f32.mrf.mxu0 }
 0x169   : > { %v441_v14 = vpop.xlane.xlu0 %440 }
 0x16a   : > { %v442_v15 = vmax.f32 %v438_v13, %v441_v14 }
 0x16c   : > { %v443_v16 = vsub.f32 %v438_v13, %v442_v15  ;;  %519 = vst.msk [vmem:[#allocation2] sm:$0xff] %vm376_vm2, %v442_v15  ;;  %448 = vperm.xlu0 %772, %v442_v15  }
 0x16e   : > { %v444_v23 = vmul.f32 1.442695, %v443_v16 }
 0x1e7   : > { %v449_v19 = vpop.permute.xlu0 %448 }
 0x1e8   : > { %v451_v20 = vsub.f32 %v433_v7, %v449_v19 }
 0x1ea   : > { %v452_v21 = vmul.f32 1.442695, %v451_v20 }
 0x1ec   : > { %774 = vpow2.f32 %v452_v21 }
 0x1ed   : > { %776 = vpow2.f32 %v444_v23 }
 0x1f9   : > { %v775_v22 = vpop.eup %774 }
 0x1fa   : > { %v456_v24 = vsel %vm379_vm0, %v775_v22, 0.0  ;;  %v469_v25 = vpack.c.bf16 %v775_v22, %v775_v22  ;;  %v777_v26 = vpop.eup %776 }
 0x1fb   : > { %457 = vadd.xlane.f32.xlu1 %v456_v24  ;;  %v455_v28 = vmul.f32 %v777_v26, %v454_v27 }
 0x1fc   : > { %725 = vmatmul.mubr.msk.bf16.vlgmr.msra.gmra.mxu1 %vm379_vm0, %v469_v25 }
 0x20c   : > { %465 = vperm.xlu1 %773, %v777_v26  }
 0x284   : > { %v458_v29 = vpop.xlane.xlu1 %457 }
 0x285   : > { %v459_v30 = vadd.f32 %v458_v29, %v455_v28 }
 0x287   : > { %461 = vst.msk [vmem:[#allocation3] sm:$0xff] %vm376_vm2, %v459_v30 }
 0x288   : > { %v466_v34 = vpop.permute.xlu1 %465 }
 0x289   : > { %v468_v35 = vmul.f32 %v466_v34, %v462_v33 }
 0x28e   : > { %v524_v31 = vld [vmem:[#allocation3] sm:$0xff] }
 0x28f   : > { %778 = vrcp.f32 %v524_v31 }
 0x29c   : > { %v779_v32 = vpop.eup %778 }
 0x29d   : > { %528 = vperm.xlu1 %773, %v779_v32  }
 0x2bc   : > { %v511_v36 = vpop.f32.mrf.mxu1 }
 0x2bd   : > { %v517_v37 = vadd.f32 %v511_v36, %v468_v35 }
 0x2be   : > { %v726_v38 = vpop.f32.mrf.mxu1 }
 0x2bf   : > { %518 = vst.msk [vmem:[#allocation4] sm:$0xff] %vm379_vm0, %v517_v37 }
 0x2c0   : > { %v514_v39 = vpop.f32.mrf.mxu1 }
 0x2c2   : > { %v727_v40 = vpop.f32.mrf.mxu1 }
 0x2c6   : > { %v523_v41 = vld [vmem:[#allocation4] sm:$0xff] }
 0x318   : > { %v529_v42 = vpop.permute.xlu1 %528 }
 0x319   : > { %v531_v43 = vmul.f32 %v529_v42, %v523_v41 }
 0x31b   : > { %v532_v44 = vpack.c.bf16 %v531_v43, %v531_v43 }
 0x31d   : > { %534 = vst.msk [vmem:[%s370_s13] sm:$0xf] %vm533_vm4, %v532_v44 }
 0x31e PF: > { %s14_s19 = sadd.s32 1, %s818_s19   ;;  %s931_s15 = smov %s810_s17 }
 0x31f   : > { %p11_p7 = scmp.ge.s32.totalorder %s14_s19, 10   ;;  %s932_s16 = smov %s814_s18 }
 0x320   : > { %s933_s17 = smov %s936_s20  ;;  %s934_s18 = smov %s940_s21 }
 0x321   :  { %13 = sbr.rel (!%p11_p7) target bundleno = 3 (0x3), region = 83 }

// kernel: transformer_layer.4
= control target key start
LH: loop header
LB: loop body
LE: loop exit
PB: predicated region body
PF: predicated region fallthrough
CT: control target
= control target key end

     0   :  { %s1218_s30 = smov 0   ;;  %s1220_s10 = smov 0   ;;  %s1309_s0 = inlined_call_operand.vmem [shape: bf16[2,8,32], index: 0, kind: input, shape index: {}]   ;;  %s1310_s1 = inlined_call_operand.vmem [shape: bf16[4,32,8], index: 1, kind: input, shape index: {}]   ;;  %s1311_s2 = inlined_call_operand.vmem [shape: f32[4,1,8], index: 2, kind: input, shape index: {}]   ;;  %s1312_s3 = inlined_call_operand.vmem [shape: bf16[4,32,8], index: 3, kind: input, shape index: {}]   ;;  %s1313_s4 = inlined_call_operand.vmem [shape: f32[4,1,8], index: 4, kind: input, shape index: {}]   ;;  %s1314_s5 = inlined_call_operand.vmem [shape: bf16[4,32,8], index: 5, kind: input, shape index: {}]   ;;  %s1315_s6 = inlined_call_operand.vmem [shape: f32[4,1,8], index: 6, kind: input, shape index: {}]   ;;  %s1316_s7 = inlined_call_operand.vmem [shape: bf16[2,4,8,8], index: 7, kind: output, shape index: {0}]   ;;  %s1317_s8 = inlined_call_operand.vmem [shape: bf16[2,4,8,8], index: 8, kind: output, shape index: {1}]   ;;  %s1318_s9 = inlined_call_operand.vmem [shape: bf16[2,4,8,8], index: 9, kind: output, shape index: {2}]  }
   0x1   :  { %s1222_s11 = smov 0   ;;  %s1224_s12 = smov 0  }
   0x2   :  { %s1226_s13 = smov 0  }
   0x3 LB: > { %s32_s14 = sadd.s32 1, %s1156_s11  ;;  %s39_s15 = sadd.s32 1, %s1160_s12  ;;  %s1164_s13 = sphi %s1226_s13, %s20_s13   ;;  %s1160_s12 = sphi %s1224_s12, %s1322_s12   ;;  %s1156_s11 = sphi %s1222_s11, %s1321_s11   ;;  %s1152_s10 = sphi %s1220_s10, %s1320_s10   ;;  %s1148_s30 = sphi %s1218_s30, %s1319_s30  }
   0x4   : > { %p33_p0 = scmp.ge.s32.totalorder %s32_s14, 4  ;;  %p1014_p1 = scmp.ge.s32.totalorder %s1164_s13, 1 }
   0x5   : > { %p381_p2 = scmp.lt.s32.totalorder %s1164_s13, 9 }
   0x6   : > { %s1324_s14 = smov (%p33_p0, %s32_s14), 0  ;;  %s1326_s15 = smov (!%p33_p0, %s39_s15), %s1160_s12 }
   0x7   : > { %p382_p3 = pnand %p1014_p1, %p381_p2  ;;  %p41_p4 = scmp.ge.s32.totalorder %s1326_s15, 2 }
   0x8   : > { %p478_p5 = scmp.lt.s32.totalorder (!%p382_p3), %s1148_s30, 3  ;;  %p471_p6 = scmp.lt.s32.totalorder (!%p382_p3), %s1152_s10, 1 }
   0x9   : > { %s1328_s15 = smov (%p41_p4, %s1326_s15), 0  ;;  %385 = sbr.rel (%p382_p3) target bundleno = 232 (0xe8), region = 48 }
   0xe   : > { %v1166_v0 = vmov 0.0   ;;  %s1330_s30 = smov (!%p478_p5, %s1148_s30), 3  ;;  %vm1167_vm0 = vmmov 0   ;;  %s1332_s10 = smov (!%p471_p6, %s1152_s10), 1  ;;  %vm560_vm1 = vcmask 261120   ;;  %vm605_vm2 = vcmask 60416  }
   0xf   : > { %1054 = vmatprep.subr.bf16.mxu0 %v1166_v0  ;;  %1062 = vmatprep.subr.bf16.mxu1 %v1166_v0  ;;  %s1042_s16 = sshll.u32 %s1330_s30, 4  ;;  %s1015_s23 = sshll.u32 %s1332_s10, 2 }
  0x10   : > { %1058 = vmatprep.mubr.msk.bf16.mxu0 %vm1167_vm0, %v1166_v0  ;;  %1066 = vmatprep.mubr.msk.bf16.mxu1 %vm1167_vm0, %v1166_v0  ;;  %s482_s19 = scalar_lea.vmem %s1310_s1, %s1042_s16  ;;  %s490_s22 = scalar_lea.vmem %s1312_s3, %s1042_s16 }
  0x11   : > { %v1120_v1 = vld [vmem:[%s482_s19 + $0x8] sm:$0xff]   ;;  %v1122_v3 = vld [vmem:[%s482_s19] sm:$0xff]   ;;  %s498_s26 = scalar_lea.vmem %s1314_s5, %s1042_s16  ;;  %s477_s29 = scalar_lea.vmem %s1309_s0, %s1015_s23 }
  0x12   : > { %v1121_v2 = vld [vmem:[%s490_s22 + $0x8] sm:$0xff]   ;;  %1055 = vmatpush3.bf16.msra.mxu0 %v1120_v1  ;;  %v1123_v4 = vld [vmem:[%s490_s22] sm:$0xff]   ;;  %s485_s17 = scalar_lea.vmem %s1311_s2, %s1330_s30  ;;  %s510_s18 = sadd.s32 %s1015_s23, %s1330_s30 }
  0x13   : > { %1056 = vmatprep.subr.bf16.mxu0 %v1166_v0  ;;  %1063 = vmatpush3.bf16.msra.mxu1 %v1121_v2  ;;  %v536_v5 = vld [vmem:[%s477_s29] sm:$0xf]  ;;  %v1124_v6 = vld [vmem:[%s498_s26 + $0x8] sm:$0xff]   ;;  %s493_s21 = scalar_lea.vmem %s1313_s4, %s1330_s30  ;;  %s1023_s22 = sshll.u32 %s510_s18, 2 }
  0x14   : > { %1064 = vmatprep.subr.bf16.mxu1 %v1166_v0  ;;  %v1125_v7 = vld [vmem:[%s498_s26] sm:$0xff]   ;;  %s512_s26 = scalar_lea.vmem %s1316_s7, %s1023_s22  ;;  %s523_s28 = scalar_lea.vmem %s1317_s8, %s1023_s22 }
  0x15   : > { %v1028_v8 = vld [vmem:[%s485_s17] ss:$0 sm:$0xff]  ;;  %s501_s16 = scalar_lea.vmem %s1315_s6, %s1330_s30  ;;  %s534_s19 = scalar_lea.vmem %s1318_s9, %s1023_s22 }
  0x16   : > { %1057 = vmatpush3.bf16.msra.mxu0 %v1122_v3  ;;  %v1032_v9 = vld [vmem:[%s493_s21] ss:$0 sm:$0xff] }
  0x17   : > { %1065 = vmatpush3.bf16.msra.mxu1 %v1123_v4  ;;  %1070 = vmatprep.subr.bf16.mxu0 %v1166_v0  ;;  %v1036_v21 = vld [vmem:[%s501_s16] ss:$0 sm:$0xff] }
  0x19   : > { %1059 = vmatmul.mubr.msk.bf16.vlgmr.msra.gmra.mxu0 %vm560_vm1, %v536_v5 }
  0x1a   : > { %1071 = vmatpush3.bf16.msra.mxu0 %v1124_v6  ;;  %1067 = vmatmul.mubr.msk.bf16.vlgmr.msra.gmra.mxu1 %vm560_vm1, %v536_v5 }
  0x1b   : > { %1072 = vmatprep.subr.bf16.mxu0 %v1166_v0  ;;  %1074 = vmatprep.mubr.msk.bf16.mxu0 %vm1167_vm0, %v1166_v0 }
  0x1e   : > { %1073 = vmatpush3.bf16.msra.mxu0 %v1125_v7 }
  0x21   : > { %1075 = vmatmul.mubr.msk.bf16.vlgmr.msra.gmra.mxu0 %vm560_vm1, %v536_v5 }
  0xd9   : > { %v598_v10 = vpop.f32.mrf.mxu0 }
  0xda   : > { %v599_v11 = vadd.f32 %v1028_v8, %v598_v10  ;;  %v664_v12 = vpop.f32.mrf.mxu1 }
  0xdb   : > { %v1060_v13 = vpop.f32.mrf.mxu0  ;;  %v665_v14 = vadd.f32 %v1032_v9, %v664_v12 }
  0xdc   : > { %v604_v15 = vpack.c.bf16 %v599_v11, %v599_v11  ;;  %v1068_v16 = vpop.f32.mrf.mxu1 }
  0xdd   : > { %v670_v17 = vpack.c.bf16 %v665_v14, %v665_v14  ;;  %v601_v18 = vpop.f32.mrf.mxu0 }
  0xde   : > { %606 = vst.msk [vmem:[%s512_s26] sm:$0xf] %vm605_vm2, %v604_v15  ;;  %v667_v19 = vpop.f32.mrf.mxu1 }
  0xdf   : > { %671 = vst.msk [vmem:[%s523_s28] sm:$0xf] %vm605_vm2, %v670_v17  ;;  %v1061_v20 = vpop.f32.mrf.mxu0 }
  0xe0   : > { %v1069_v22 = vpop.f32.mrf.mxu1 }
  0xe1   : > { %v729_v23 = vpop.f32.mrf.mxu0 }
  0xe2   : > { %v730_v24 = vadd.f32 %v1036_v21, %v729_v23 }
  0xe3   : > { %v1076_v25 = vpop.f32.mrf.mxu0 }
  0xe4   : > { %v735_v26 = vpack.c.bf16 %v730_v24, %v730_v24 }
  0xe5   : > { %v732_v27 = vpop.f32.mrf.mxu0 }
  0xe6   : > { %736 = vst.msk [vmem:[%s534_s19] sm:$0xf] %vm605_vm2, %v735_v26 }
  0xe7   : > { %v1077_v28 = vpop.f32.mrf.mxu0 }
  0xe8 PF: > { %s20_s13 = sadd.s32 1, %s1164_s13   ;;  %s1319_s30 = smov %s1156_s11 }
  0xe9   : > { %p17_p7 = scmp.ge.s32.totalorder %s20_s13, 10   ;;  %s1320_s10 = smov %s1160_s12 }
  0xea   : > { %s1321_s11 = smov %s1324_s14  ;;  %s1322_s12 = smov %s1328_s15 }
  0xeb   :  { %19 = sbr.rel (!%p17_p7) target bundleno = 3 (0x3), region = 120 }

// kernel: transformer_layer.7
= control target key start
LH: loop header
LB: loop body
LE: loop exit
PB: predicated region body
PF: predicated region fallthrough
CT: control target
= control target key end

     0   :  { %v386_v1 = vmov 0.0   ;;  %vm387_vm0 = vmmov 0   ;;  %vm32_vm1 = vcmask 261120   ;;  %vm45_vm2 = vcmask 257024   ;;  %s486_s0 = inlined_call_operand.vmem [shape: f32[16,32], index: 0, kind: input, shape index: {}]   ;;  %s487_s1 = inlined_call_operand.vmem [shape: bf16[32,64], index: 1, kind: input, shape index: {}]   ;;  %s488_s2 = inlined_call_operand.vmem [shape: f32[1,64], index: 2, kind: input, shape index: {}]   ;;  %s489_s3 = inlined_call_operand.vmem [shape: bf16[64,32], index: 3, kind: input, shape index: {}]   ;;  %s490_s4 = inlined_call_operand.vmem [shape: f32[1,32], index: 4, kind: input, shape index: {}]   ;;  %s491_s5 = inlined_call_operand.vmem [shape: f32[1,32], index: 5, kind: input, shape index: {}]   ;;  %s492_s6 = inlined_call_operand.vmem [shape: f32[1,32], index: 6, kind: input, shape index: {}]   ;;  %s493_s7 = inlined_call_operand.hbm [shape: f32[16,32], index: 7, kind: output, shape index: {}]  }
   0x1   :  { %v349_v0 = vld [vmem:[%s487_s1 + $0x8] sm:$0xff]   ;;  %324 = vmatprep.subr.bf16.mxu0 %v386_v1  ;;  %332 = vmatprep.subr.bf16.mxu1 %v386_v1  ;;  %v350_v2 = vld [vmem:[%s487_s1] sm:$0xff]   ;;  %33 = vst.msk [vmem:[#allocation2] sm:$0xff] %vm32_vm1, %v386_v1  ;;  %34 = vst.msk [vmem:[#allocation2 + $0x8] sm:$0xff] %vm32_vm1, %v386_v1 }
   0x2   :  { %325 = vmatpush3.bf16.msra.mxu0 %v349_v0  ;;  %328 = vmatprep.mubr.msk.bf16.mxu0 %vm387_vm0, %v386_v1  ;;  %v35_v3 = vld [vmem:[%s486_s0] sm:$0xff]  ;;  %v443_v4 = vld [vmem:[%s486_s0 + $0x8] sm:$0xff] }
   0x3   :  { %326 = vmatprep.subr.bf16.mxu0 %v386_v1  ;;  %v314_v5 = vpack.c.bf16 %v35_v3, %v35_v3  ;;  %v315_v6 = vpack.c.bf16 %v443_v4, %v443_v4  ;;  %340 = vmatprep.mubr.msk.bf16.mxu1 %vm387_vm0, %v386_v1 }
   0x5   :  { %46 = vst.msk [vmem:[#allocation3] sm:$0xf] %vm45_vm2, %v314_v5  ;;  %47 = vst.msk [vmem:[#allocation3 + $0x4] sm:$0xf] %vm45_vm2, %v315_v6 }
   0x6   :  { %12 = vsyncpa [#allocation5], 0  ;;  %327 = vmatpush3.bf16.msra.mxu0 %v350_v2  ;;  %v352_v8 = vld [vmem:[%s489_s3 + $0x18] sm:$0xff]   ;;  %v353_v9 = vld [vmem:[%s489_s3 + $0x10] sm:$0xff]   ;;  %vm169_vm3 = vcmask 523264   ;;  %s388_s20 = smov [#allocation4]  }
   0x7   :  { %333 = vmatpush3.bf16.msra.mxu1 %v352_v8  ;;  %v354_v10 = vld [vmem:[%s489_s3 + $0x8] sm:$0xff]   ;;  %v355_v11 = vld [vmem:[%s489_s3] sm:$0xff]   ;;  %s288_s21 = sshll.u32 %s388_s20, 4  ;;  %s289_s21 = int_to_ptr.vmem [resolvable:$true] %s288_s21 }
   0x8   :  { %334 = vmatprep.subr.bf16.mxu1 %v386_v1  ;;  %v301_v12 = vld [vmem:[%s488_s2] ss:$0 sm:$0xff]  ;;  %v135_v34 = vld [vmem:[#allocation2 + $0x8] sm:$0xff]  ;;  %s364_s22 = scalar_lea.vmem %s289_s21, 256  ;;  %p369_p1 = scmp.lt.s32.totalorder %s289_s21, %s289_s21 }
   0x9   :  { %v134_v30 = vld [vmem:[#allocation2] sm:$0xff]  ;;  %p365_p0 = scmp.ne.s32.totalorder %s289_s21, %s364_s22  ;;  %p370_p2 = scmp.lt.s32.totalorder %s364_s22, %s364_s22 }
   0xa   :  { %v311_v39 = vld [vmem:[%s490_s4] ss:$0 sm:$0xff] }
   0xb   :  { %335 = vmatpush3.bf16.msra.mxu1 %v353_v9  ;;  %v312_v0 = vld [vmem:[%s491_s5] ss:$0 sm:$0xff]  ;;  %p371_p3 = por %p370_p2, %p369_p1 }
   0xc   :  { %v351_v7 = vld [vmem:[#allocation3] sm:$0xff]   ;;  %336 = vmatprep.subr.bf16.mxu1 %v386_v1  ;;  %v313_v2 = vld [vmem:[%s492_s6] ss:$0 sm:$0xff] }
   0xd   :  { %329 = vmatmul.mubr.msk.bf16.vlgmr.msra.gmra.mxu0 %vm32_vm1, %v351_v7  ;;  %p372_p4 = pnand %p371_p3, %p365_p0 }
   0xf   :  { %337 = vmatpush3.bf16.msra.mxu1 %v354_v10 }
  0x10   :  { %338 = vmatprep.subr.bf16.mxu1 %v386_v1 }
  0x13   :  { %339 = vmatpush3.bf16.msra.mxu1 %v355_v11 }
  0xcd   :  { %v116_v13 = vpop.f32.mrf.mxu0 }
  0xce   :  { %v117_v14 = vadd.f32 %v301_v12, %v116_v13 }
  0xcf   :  { %v330_v15 = vpop.f32.mrf.mxu0 }
  0xd0   :  { %v126_v16 = vmul.f32 0.70710677, %v117_v14  ;;  %v123_v24 = vmul.f32 0.5, %v117_v14 }
  0xd1   :  { %v119_v17 = vpop.f32.mrf.mxu0 }
  0xd2   :  { %356 = verf.f32 %v126_v16  ;;  %v120_v18 = vadd.f32 %v301_v12, %v119_v17 }
  0xd3   :  { %v331_v19 = vpop.f32.mrf.mxu0 }
  0xd4   :  { %v127_v20 = vmul.f32 0.70710677, %v120_v18  ;;  %v124_v25 = vmul.f32 0.5, %v120_v18 }
  0xd6   :  { %358 = verf.f32 %v127_v20 }
  0xdf   :  { %v357_v21 = vpop.eup %356 }
  0xe0   :  { %v130_v22 = vadd.f32 1.0, %v357_v21 }
  0xe2   :  { %v132_v27 = vmul.f32 %v130_v22, %v123_v24 }
  0xe3   :  { %v359_v23 = vpop.eup %358 }
  0xe4   :  { %v131_v26 = vadd.f32 1.0, %v359_v23 }
  0xe6   :  { %v133_v28 = vmul.f32 %v131_v26, %v124_v25 }
  0xe8   :  { %v136_v29 = vpack.c.bf16 %v133_v28, %v132_v27 }
  0xea   :  { %341 = vmatmul.mubr.msk.bf16.vlgmr.msra.gmra.mxu1 %vm169_vm3, %v136_v29 }
 0x1aa   :  { %v207_v31 = vpop.f32.mrf.mxu1 }
 0x1ab   :  { %v214_v32 = vadd.f32 %v207_v31, %v134_v30 }
 0x1ac   :  { %v342_v33 = vpop.f32.mrf.mxu1 }
 0x1ad   :  { %216 = vst.msk [vmem:[#allocation2] sm:$0xff] %vm32_vm1, %v214_v32 }
 0x1ae   :  { %v210_v35 = vpop.f32.mrf.mxu1 }
 0x1af   :  { %v215_v36 = vadd.f32 %v210_v35, %v135_v34 }
 0x1b0   :  { %v343_v37 = vpop.f32.mrf.mxu1 }
 0x1b1   :  { %217 = vst.msk [vmem:[#allocation2 + $0x8] sm:$0xff] %vm32_vm1, %v215_v36 }
 0x1b4   :  { %v223_v38 = vld [vmem:[#allocation2] sm:$0xff] }
 0x1b5   :  { %v225_v40 = vadd.f32 %v223_v38, %v35_v3 }
 0x1b7   :  { %v234_v41 = vadd.f32 %v311_v39, %v225_v40 }
 0x1b8   :  { %v224_v42 = vld [vmem:[#allocation2 + $0x8] sm:$0xff] }
 0x1b9   :  { %v238_v43 = vsel %vm32_vm1, %v234_v41, 0.0  ;;  %v226_v44 = vadd.f32 %v224_v42, %v443_v4 }
 0x1ba   :  { %239 = vadd.xlane.f32.xlu0 %v238_v43 }
 0x1bb   :  { %v235_v45 = vadd.f32 %v311_v39, %v226_v44 }
 0x1bd   :  { %v241_v46 = vsel %vm32_vm1, %v235_v45, 0.0 }
 0x1be   :  { %242 = vadd.xlane.f32.xlu0 %v241_v46 }
 0x243   :  { %v240_v47 = vpop.xlane.xlu0 %239 }
 0x244   :  { %v245_v48 = vmul.f32 0.03125, %v240_v47 }
 0x246   :  { %v247_v49 = vsub.f32 %v234_v41, %v245_v48 }
 0x247   :  { %v243_v50 = vpop.xlane.xlu0 %242 }
 0x248   :  { %v246_v51 = vmul.f32 0.03125, %v243_v50  ;;  %v249_v52 = vmul.f32 %v247_v49, %v247_v49 }
 0x24a   :  { %v248_v53 = vsub.f32 %v235_v45, %v246_v51  ;;  %v251_v54 = vsel %vm32_vm1, %v249_v52, 0.0 }
 0x24b   :  { %252 = vadd.xlane.f32.xlu1 %v251_v54 }
 0x24c   :  { %v250_v55 = vmul.f32 %v248_v53, %v248_v53 }
 0x24e   :  { %v254_v56 = vsel %vm32_vm1, %v250_v55, 0.0 }
 0x24f   :  { %255 = vadd.xlane.f32.xlu1 %v254_v56 }
 0x2d4   :  { %v253_v57 = vpop.xlane.xlu1 %252 }
 0x2d5   :  { %v257_v58 = vmul.f32 0.03125, %v253_v57 }
 0x2d7   :  { %v259_v59 = vadd.f32 1e-12, %v257_v58 }
 0x2d8   :  { %v256_v60 = vpop.xlane.xlu1 %255 }
 0x2d9   :  { %360 = vrsqrt.f32 %v259_v59  ;;  %v258_v61 = vmul.f32 0.03125, %v256_v60 }
 0x2db   :  { %v260_v62 = vadd.f32 1e-12, %v258_v61 }
 0x2dd   :  { %362 = vrsqrt.f32 %v260_v62 }
 0x2e6   :  { %v361_v63 = vpop.eup %360 }
 0x2e7   :  { %v263_v1 = vmul.f32 %v361_v63, %v247_v49 }
 0x2e9   :  { %v271_v3 = vmul.f32 %v312_v0, %v263_v1 }
 0x2ea   :  { %v363_v4 = vpop.eup %362 }
 0x2eb   :  { %v264_v5 = vmul.f32 %v363_v4, %v248_v53  ;;  %v279_v6 = vadd.f32 %v313_v2, %v271_v3 }
 0x2ed   :  { %v272_v7 = vmul.f32 %v312_v0, %v264_v5  ;;  %281 = vst.msk [vmem:[#allocation4] sm:$0xff] %vm32_vm1, %v279_v6 }
 0x2ef   :  { %v280_v8 = vadd.f32 %v313_v2, %v272_v7 }
 0x2f1   :  { %282 = vst.msk [vmem:[#allocation4 + $0x8] sm:$0xff] %vm32_vm1, %v280_v8 }
 0x2f2   :  { %375 = shalt.err (!%p372_p4)
}
 0x2f3   :  { %s389_s5 = smov 128   ;;  %s390_s6 = smov 8  }
 0x2f4   :  { %294 = dma.vmem_to_hbm [thread:$0]  %s289_s21, 256, %s493_s7, [#allocation5], %s389_s5, %s389_s5, %s390_s6  }
 0x2f5   :  { %384 = dma.done.wait [#allocation5], 256  }
 0x2f6   :  { %385 = vsyncadd [#allocation5], 4294967040 }
 0x2f7   :  { %298 = vsyncpa [#allocation5], 1 }

// kernel: transformer_layer.6
= control target key start
LH: loop header
LB: loop body
LE: loop exit
PB: predicated region body
PF: predicated region fallthrough
CT: control target
= control target key end

     0   :  { %s713_s21 = smov 0   ;;  %s715_s22 = smov 0   ;;  %s792_s0 = inlined_call_operand.vmem [shape: bf16[2,4,8,8], index: 0, kind: input, shape index: {}]   ;;  %s793_s1 = inlined_call_operand.vmem [shape: bf16[4,8,32], index: 1, kind: input, shape index: {}]   ;;  %s794_s2 = inlined_call_operand.vmem [shape: f32[1,32], index: 2, kind: input, shape index: {}]   ;;  %s795_s3 = inlined_call_operand.vmem [shape: f32[2,8,32], index: 3, kind: input, shape index: {}]   ;;  %s796_s4 = inlined_call_operand.vmem [shape: f32[1,32], index: 4, kind: input, shape index: {}]   ;;  %s797_s5 = inlined_call_operand.vmem [shape: f32[1,32], index: 5, kind: input, shape index: {}]   ;;  %s798_s6 = inlined_call_operand.vmem [shape: f32[2,8,32], index: 6, kind: output, shape index: {}]  }
   0x1   :  { %s717_s23 = smov 0   ;;  %s719_s24 = smov 0  }
   0x2   :  { %s721_s25 = smov 0  }
   0x3 LB: > { %s28_s26 = sadd.s32 1, %s665_s23  ;;  %s35_s27 = sadd.s32 1, %s669_s24  ;;  %s673_s25 = sphi %s721_s25, %s16_s25   ;;  %s669_s24 = sphi %s719_s24, %s804_s24   ;;  %s665_s23 = sphi %s717_s23, %s803_s23   ;;  %s661_s22 = sphi %s715_s22, %s802_s22   ;;  %s657_s21 = sphi %s713_s21, %s801_s21  }
   0x4   : > { %p29_p0 = scmp.ge.s32.totalorder %s28_s26, 4  ;;  %p568_p1 = scmp.ge.s32.totalorder %s673_s25, 1 }
   0x5   : > { %p266_p2 = scmp.lt.s32.totalorder %s673_s25, 9 }
   0x6   : > { %s806_s26 = smov (%p29_p0, %s28_s26), 0  ;;  %s808_s27 = smov (!%p29_p0, %s35_s27), %s669_s24 }
   0x7   : > { %p267_p3 = pnand %p568_p1, %p266_p2  ;;  %p37_p4 = scmp.ge.s32.totalorder %s808_s27, 2 }
   0x8   : > { %p315_p5 = scmp.lt.s32.totalorder (!%p267_p3), %s661_s22, 1  ;;  %p317_p6 = scmp.lt.s32.totalorder (!%p267_p3), %s657_s21, 3 }
   0x9   : > { %s810_s27 = smov (%p37_p4, %s808_s27), 0  ;;  %270 = sbr.rel (%p267_p3) target bundleno = 548 (0x224), region = 44 }
   0xa   : > { %799 = sst [smem:[#allocation3_spill]] %s810_s27  ;;  %p574_p7 = scmp.ne.s32.totalorder (!%p267_p3), %s657_s21, 0 }
   0xe   : > { %s812_s22 = smov (!%p315_p5, %s661_s22), 1 }
   0xf   : > { %s318_s28 = scalar_select %p317_p6, %s657_s21, 3 }
  0x10   : > { %s569_s29 = sshll.u32 %s812_s22, 2  ;;  %s572_s30 = sshll.u32 %s812_s22, 3 }
  0x11   : > { %s323_s7 = sadd.s32 %s569_s29, %s318_s28  ;;  %s571_s8 = sshll.u32 %s318_s28, 2 }
  0x12   : > { %s570_s9 = sshll.u32 %s323_s7, 2  ;;  %s329_s12 = scalar_lea.vmem %s793_s1, %s571_s8 }
  0x13   : > { %s325_s15 = scalar_lea.vmem %s792_s0, %s570_s9  ;;  %s336_s18 = scalar_lea.vmem %s795_s3, %s572_s30 }
  0x14   : > { %s759_s27 = scalar_lea.vmem %s798_s6, %s572_s30  ;;  %348 = sbr.rel (%p574_p7) target bundleno = 27 (0x1b), region = 48 }
  0x19   : > { %vm349_vm0 = vcmask 261120   ;;  %v675_v0 = vmov 0.0  }
  0x1a   : > { %350 = vst.msk [vmem:[#allocation2] sm:$0xff] %vm349_vm0, %v675_v0 }
  0x1b PF: > { %v353_v1 = vld [vmem:[%s329_s12] sm:$0xf]  ;;  %vm358_vm1 = vcmask 1043456   ;;  %v676_v2 = vmov 0.0   ;;  %vm677_vm2 = vmmov 0   ;;  %vm354_vm3 = vcmask 64512  }
  0x1c   : > { %584 = vmatprep.subr.bf16.mxu0 %v676_v2  ;;  %v360_v3 = vsel %vm358_vm1, %v353_v1, 0  ;;  %586 = vmatprep.mubr.msk.bf16.mxu0 %vm677_vm2, %v676_v2  ;;  %v352_v4 = vld [vmem:[%s325_s15] sm:$0xf]  ;;  %vm403_vm4 = vcmask 261120   ;;  %p576_p8 = scmp.ne.s32.totalorder %s657_s21, 3 }
  0x1d   : > { %585 = vmatpush3.bf16.msra.mxu0 %v360_v3 }
  0x20   : > { %587 = vmatmul.mubr.msk.bf16.vlgmr.msra.gmra.mxu0 %vm354_vm3, %v352_v4 }
  0x21   : > { %v351_v5 = vld [vmem:[#allocation2] sm:$0xff] }
  0xe0   : > { %v396_v6 = vpop.f32.mrf.mxu0 }
  0xe1   : > { %v402_v7 = vadd.f32 %v396_v6, %v351_v5 }
  0xe2   : > { %v588_v8 = vpop.f32.mrf.mxu0  ;;  %408 = sbr.rel (%p576_p8) target bundleno = 548 (0x224), region = 52 }
  0xe3   : > { %404 = vst.msk [vmem:[#allocation2] sm:$0xff] %vm403_vm4, %v402_v7 }
  0xe4   : > { %v399_v9 = vpop.f32.mrf.mxu0 }
  0xe6   : > { %v589_v10 = vpop.f32.mrf.mxu0 }
  0xe7   : > { %v409_v11 = vld [vmem:[%s336_s18] sm:$0xff] }
  0xe8   : > { %v577_v13 = vld [vmem:[%s794_s2] ss:$0 sm:$0xff] }
  0xe9   : > { %v578_v26 = vld [vmem:[%s796_s4] ss:$0 sm:$0xff] }
  0xea   : > { %v410_v12 = vld [vmem:[#allocation2] sm:$0xff] }
  0xeb   : > { %v411_v14 = vadd.f32 %v410_v12, %v409_v11  ;;  %v579_v28 = vld [vmem:[%s797_s5] ss:$0 sm:$0xff] }
  0xed   : > { %v419_v15 = vadd.f32 %v577_v13, %v411_v14 }
  0xef   : > { %v422_v16 = vsel %vm403_vm4, %v419_v15, 0.0 }
  0xf0   : > { %423 = vadd.xlane.f32.xlu0 %v422_v16 }
 0x179   : > { %v424_v17 = vpop.xlane.xlu0 %423 }
 0x17a   : > { %v426_v18 = vmul.f32 0.03125, %v424_v17 }
 0x17c   : > { %v427_v19 = vsub.f32 %v419_v15, %v426_v18 }
 0x17e   : > { %v428_v20 = vmul.f32 %v427_v19, %v427_v19 }
 0x180   : > { %v429_v21 = vsel %vm403_vm4, %v428_v20, 0.0 }
 0x181   : > { %430 = vadd.xlane.f32.xlu0 %v429_v21 }
 0x20a   : > { %v431_v22 = vpop.xlane.xlu0 %430 }
 0x20b   : > { %v432_v23 = vmul.f32 0.03125, %v431_v22 }
 0x20d   : > { %v433_v24 = vadd.f32 1e-12, %v432_v23 }
 0x20f   : > { %633 = vrsqrt.f32 %v433_v24 }
 0x21c   : > { %v634_v25 = vpop.eup %633 }
 0x21d   : > { %v435_v27 = vmul.f32 %v634_v25, %v427_v19 }
 0x21f   : > { %v442_v29 = vmul.f32 %v578_v26, %v435_v27 }
 0x221   : > { %v449_v30 = vadd.f32 %v579_v28, %v442_v29 }
 0x223   : > { %450 = vst.msk [vmem:[%s759_s27] sm:$0xff] %vm403_vm4, %v449_v30 }
 0x224 PF: > { %s16_s25 = sadd.s32 1, %s673_s25   ;;  %s800_s8 = sld [smem:[#allocation3_spill]] }
 0x225   : > { %p13_p9 = scmp.ge.s32.totalorder %s16_s25, 10   ;;  %s801_s21 = smov %s665_s23 }
 0x226   : > { %s802_s22 = smov %s669_s24  ;;  %s803_s23 = smov %s806_s26 }
 0x227   :  { %15 = sbr.rel (!%p13_p9) target bundleno = 3 (0x3), region = 88 }
 0x22a   : > { %s804_s24 = smov %s800_s8 }

</bundles_post_ra>
